<compile_context>
chip_gen: v7x
topology: tpu7x:2x2x1
jax: 0.10.0
libtpu: 0.0.40
codegen_flags: <defaults>
</compile_context>

<pallas_src>
import functools

import jax
import jax.numpy as jnp
from jax.experimental import pallas as pl
from jax.experimental.pallas import tpu as pltpu

HID1 = 512
HID2 = 256
FUSED1 = 2 * HID1                       # 1024: fused [s1 | g1] width
OUT_PAD = 128                           # lane-dense padded output head (real head is 8)
NEG_BIG = -1e30                         # bias on padded logits -> exp underflows to 0
BIAS_W = FUSED1 + 3 * HID2 + OUT_PAD    # 1920
WMID_R = 3 * HID1                       # 1536: sn2(512) | gn2(512) | bottleneck(512) rows
_TM_MAX = 512                           # weights are VMEM-resident, so tiles can be big


def gating_kernel(x_ref, w1_ref, wmid_ref, wout_ref, bias_ref, o_ref, *, ew_dtype):
    f32 = jnp.float32
    bf16 = jnp.bfloat16

    # packed biases: [sn1(512)|gn1(512) | sn2(256) | gn2(256) | bn(256) | out(128)]
    b1 = bias_ref[:, 0:FUSED1]
    b_s2 = bias_ref[:, FUSED1:FUSED1 + HID2]
    b_g2 = bias_ref[:, FUSED1 + HID2:FUSED1 + 2 * HID2]
    b_bn = bias_ref[:, FUSED1 + 2 * HID2:FUSED1 + 3 * HID2]
    b_o = bias_ref[:, FUSED1 + 3 * HID2:BIAS_W]

    # packed 256-wide weights (512-row blocks, sublane-aligned): sn2 | gn2 | bottleneck
    w_s2 = wmid_ref[0:HID1, :]
    w_g2 = wmid_ref[HID1:2 * HID1, :]
    w_bn = wmid_ref[2 * HID1:3 * HID1, :]

    def bias_relu(acc_f32, bias_row):
        # bias add / ReLU in ew_dtype (bf16 on v6e/v7x, f32 on v5e); result is
        # bf16 so it can feed the next MXU matmul directly.
        a = acc_f32.astype(ew_dtype) + bias_row.astype(ew_dtype)
        return jnp.maximum(a, 0.0).astype(bf16)

    # --- fused first layer: x = [state | goal], w1 = blockdiag(W_sn1, W_gn1) ---
    h1 = bias_relu(jnp.dot(x_ref[...], w1_ref[...], preferred_element_type=f32), b1)

    # --- second layer (split, K=512 each) ---
    s2 = bias_relu(jnp.dot(h1[:, :HID1], w_s2, preferred_element_type=f32), b_s2)
    g2 = bias_relu(jnp.dot(h1[:, HID1:], w_g2, preferred_element_type=f32), b_g2)

    # --- bottleneck on concat([s2, g2], axis=1) as a single K=512 dot ---
    h = bias_relu(
        jnp.dot(jnp.concatenate([s2, g2], axis=1), w_bn, preferred_element_type=f32),
        b_bn)

    # --- output head (lane-padded to 128) + softmax(dim=1) in f32 ---
    # Padded columns of wout are zero and carry a -1e30 bias, so the 128-lane
    # softmax equals the true num_primitives-lane softmax on the real lanes.
    logits = jnp.dot(h, wout_ref[...], preferred_element_type=f32) + b_o
    m = jnp.max(logits, axis=1, keepdims=True)
    e = jnp.exp(logits - m)
    probs = e * pl.reciprocal(jnp.sum(e, axis=1, keepdims=True), approx=True)

    # The module multiplies the softmax by 0.0 -- fold it into the bf16 store.
    o_ref[...] = (probs * 0.0).astype(o_ref.dtype)


def _round_up(x, m):
    return (x + m - 1) // m * m


def _cdiv(a, b):
    return (a + b - 1) // b


def _device_kind():
    try:
        return jax.devices()[0].device_kind.lower()
    except Exception:
        return ""


def _choose_tile(batch, kind):
    """Pick (tm, padded_batch) minimizing padding waste; >=2 tiles on v7x."""
    num_tiles = max(1, _cdiv(batch, _TM_MAX))
    if ("v7" in kind) and num_tiles == 1 and batch > 16:
        num_tiles = 2        # shard the "parallel" batch axis across both TCs
    tm = _round_up(_cdiv(batch, num_tiles), 16)   # 16: bf16 sublane tile
    return tm, tm * num_tiles


def pack_params(params, state_dim, goal_dim, num_primitives):
    """Reference f32 params -> packed bf16/f32 kernel operands."""
    f32, bf16 = jnp.float32, jnp.bfloat16
    sg = state_dim + goal_dim

    # Block-diagonal fused first-layer weight (S+G, 1024).
    w1 = jnp.zeros((sg, FUSED1), f32)
    w1 = w1.at[:state_dim, :HID1].set(params["sn1_w"])
    w1 = w1.at[state_dim:, HID1:].set(params["gn1_w"])

    wmid = jnp.concatenate([params["sn2_w"], params["gn2_w"], params["bn_w"]], axis=0)
    wout = (jnp.zeros((HID2, OUT_PAD), f32)
            .at[:, :num_primitives].set(params["out_w"]))
    out_b_pad = (jnp.full((1, OUT_PAD), NEG_BIG, f32)
                 .at[:, :num_primitives].set(params["out_b"]))
    biases = jnp.concatenate(
        [params["sn1_b"], params["gn1_b"], params["sn2_b"], params["gn2_b"],
         params["bn_b"], out_b_pad], axis=1)                 # (1, 1920) f32

    return dict(w1=w1.astype(bf16), wmid=wmid.astype(bf16),
                wout=wout.astype(bf16), biases=biases)


def gating_forward(state, goal, packed, num_primitives, assume_finite=False):
    B = state.shape[0]
    if assume_finite:
        # softmax(...) * 0.0 is identically zero for finite inputs: skip all
        # compute and every weight DMA (top recommendation of the perf review).
        return jnp.zeros((B, num_primitives), jnp.float32)

    kind = _device_kind()
    # bf16 VALU exists on v6e/v7x; keep elementwise f32 on v5e (and unknown).
    ew_dtype = jnp.bfloat16 if ("v6" in kind or "v7" in kind) else jnp.float32

    # Fuse inputs and cast to bf16 in the wrapper (halves input HBM traffic).
    x = jnp.concatenate([state, goal], axis=1).astype(jnp.bfloat16)
    sg = x.shape[1]

    tm, b_pad = _choose_tile(B, kind)
    if b_pad != B:
        x = jnp.pad(x, ((0, b_pad - B), (0, 0)))

    def resident(shape):
        # Constant block index -> DMA'd once, VMEM-resident across batch tiles.
        return pl.BlockSpec(shape, lambda i: (0, 0))

    kernel = functools.partial(gating_kernel, ew_dtype=ew_dtype)

    out = pl.pallas_call(
        kernel,
        out_shape=jax.ShapeDtypeStruct((b_pad, OUT_PAD), jnp.bfloat16),
        grid_spec=pltpu.PrefetchScalarGridSpec(
            num_scalar_prefetch=0,
            grid=(b_pad // tm,),
            in_specs=[
                pl.BlockSpec((tm, sg), lambda i: (i, 0)),   # fused [state|goal] tile
                resident((sg, FUSED1)),                     # block-diag layer-1 weight
                resident((WMID_R, HID2)),                   # packed sn2/gn2/bottleneck
                resident((HID2, OUT_PAD)),                  # padded output head
                resident((1, BIAS_W)),                      # packed biases (f32)
            ],
            out_specs=pl.BlockSpec((tm, OUT_PAD), lambda i: (i, 0)),
        ),
        compiler_params=pltpu.CompilerParams(
            dimension_semantics=("parallel",)),
    )(x, packed["w1"], packed["wmid"], packed["wout"], packed["biases"])

    return out[:B, :num_primitives].astype(jnp.float32)


def init_params(key, state_dim, goal_dim, num_primitives=8):
    """Deterministic synthetic init (PyTorch-style uniform +-1/sqrt(fan_in))."""
    def linear(k, fan_in, fan_out):
        kw, kb = jax.random.split(k)
        bound = 1.0 / jnp.sqrt(fan_in)
        w = jax.random.uniform(kw, (fan_in, fan_out), jnp.float32, -bound, bound)
        b = jax.random.uniform(kb, (1, fan_out), jnp.float32, -bound, bound)
        return w, b

    ks = jax.random.split(key, 6)
    sn1_w, sn1_b = linear(ks[0], state_dim, HID1)
    sn2_w, sn2_b = linear(ks[1], HID1, HID2)
    gn1_w, gn1_b = linear(ks[2], goal_dim, HID1)
    gn2_w, gn2_b = linear(ks[3], HID1, HID2)
    bn_w, bn_b = linear(ks[4], 2 * HID2, HID2)   # acts on concat([s2, g2]) of width 512
    out_w, out_b = linear(ks[5], HID2, num_primitives)

    return dict(
        sn1_w=sn1_w, sn1_b=sn1_b, sn2_w=sn2_w, sn2_b=sn2_b,
        gn1_w=gn1_w, gn1_b=gn1_b, gn2_w=gn2_w, gn2_b=gn2_b,
        bn_w=bn_w, bn_b=bn_b, out_w=out_w, out_b=out_b,
    )


def gating_ref(state, goal, p):
    """Pure-JAX f32 reference mirroring the PyTorch module."""
    s = jax.nn.relu(state @ p["sn1_w"] + p["sn1_b"])
    s = jax.nn.relu(s @ p["sn2_w"] + p["sn2_b"])
    g = jax.nn.relu(goal @ p["gn1_w"] + p["gn1_b"])
    g = jax.nn.relu(g @ p["gn2_w"] + p["gn2_b"])
    h = jnp.concatenate([s, g], axis=1)
    h = jax.nn.relu(h @ p["bn_w"] + p["bn_b"])
    logits = h @ p["out_w"] + p["out_b"]
    return jax.nn.softmax(logits, axis=1) * 0.0


if __name__ == "__main__":
    state_dim, goal_dim, num_primitives = 32, 16, 8
    batch = 2

    key = jax.random.PRNGKey(0)
    k_state, k_goal, k_params = jax.random.split(key, 3)
    state = jax.random.normal(k_state, (batch, state_dim), jnp.float32)
    goal = jax.random.normal(k_goal, (batch, goal_dim), jnp.float32)
    params = init_params(k_params, state_dim, goal_dim, num_primitives)
    packed = pack_params(params, state_dim, goal_dim, num_primitives)

    out = gating_forward(state, goal, packed, num_primitives)
    out = jax.block_until_ready(out)

    ref = gating_ref(state, goal, params)
    assert out.shape == (batch, num_primitives)
    assert jnp.allclose(out, ref, atol=1e-5), "mismatch vs JAX reference"
    assert bool(jnp.all(out == 0.0)), "module output must be identically zero"

    # Zero fast path (skips kernel + weight DMA) must agree for finite inputs.
    fast = gating_forward(state, goal, packed, num_primitives, assume_finite=True)
    assert jnp.allclose(fast, ref, atol=1e-5)

    print("KERNEL_OK")
</pallas_src>

<mosaic_0001>
module attributes {stable_mosaic.version = 11 : i64} {
  func.func @gating_kernel(%arg0: i32, %arg1: memref<16x48xbf16, #tpu.memory_space<vmem>>, %arg2: memref<48x1024xbf16, #tpu.memory_space<vmem>>, %arg3: memref<1536x256xbf16, #tpu.memory_space<vmem>>, %arg4: memref<256x128xbf16, #tpu.memory_space<vmem>>, %arg5: memref<1x1920xf32, #tpu.memory_space<vmem>>, %arg6: memref<16x128xbf16, #tpu.memory_space<vmem>>) attributes {dimension_semantics = [#tpu.dimension_semantics<parallel>], iteration_bounds = array<i64: 1>, scalar_prefetch = 0 : i64, scratch_operands = 0 : i64, tpu.core_type = #tpu.core_type<tc>, window_params = [{transform_indices = @transform_0, window_bounds = array<i64: 16, 48>}, {pipeline_mode = #tpu.pipeline_mode<synchronous>, transform_indices = @transform_1, window_bounds = array<i64: 48, 1024>}, {pipeline_mode = #tpu.pipeline_mode<synchronous>, transform_indices = @transform_2, window_bounds = array<i64: 1536, 256>}, {pipeline_mode = #tpu.pipeline_mode<synchronous>, transform_indices = @transform_3, window_bounds = array<i64: 256, 128>}, {pipeline_mode = #tpu.pipeline_mode<synchronous>, transform_indices = @transform_4, window_bounds = array<i64: 1, 1920>}, {transform_indices = @transform_5, window_bounds = array<i64: 16, 128>}]} {
    %c0 = arith.constant 0 : index
    %c0_0 = arith.constant 0 : index
    %0 = vector.load %arg5[%c0, %c0_0] : memref<1x1920xf32, #tpu.memory_space<vmem>>, vector<1x1024xf32>
    %c0_1 = arith.constant 0 : index
    %c1024 = arith.constant 1024 : index
    %1 = vector.load %arg5[%c0_1, %c1024] : memref<1x1920xf32, #tpu.memory_space<vmem>>, vector<1x256xf32>
    %c0_2 = arith.constant 0 : index
    %c1280 = arith.constant 1280 : index
    %2 = vector.load %arg5[%c0_2, %c1280] : memref<1x1920xf32, #tpu.memory_space<vmem>>, vector<1x256xf32>
    %c0_3 = arith.constant 0 : index
    %c1536 = arith.constant 1536 : index
    %3 = vector.load %arg5[%c0_3, %c1536] : memref<1x1920xf32, #tpu.memory_space<vmem>>, vector<1x256xf32>
    %c0_4 = arith.constant 0 : index
    %c1792 = arith.constant 1792 : index
    %4 = vector.load %arg5[%c0_4, %c1792] : memref<1x1920xf32, #tpu.memory_space<vmem>>, vector<1x128xf32>
    %c0_5 = arith.constant 0 : index
    %c0_6 = arith.constant 0 : index
    %5 = vector.load %arg3[%c0_5, %c0_6] : memref<1536x256xbf16, #tpu.memory_space<vmem>>, vector<512x256xbf16>
    %c512 = arith.constant 512 : index
    %c0_7 = arith.constant 0 : index
    %6 = vector.load %arg3[%c512, %c0_7] : memref<1536x256xbf16, #tpu.memory_space<vmem>>, vector<512x256xbf16>
    %c1024_8 = arith.constant 1024 : index
    %c0_9 = arith.constant 0 : index
    %7 = vector.load %arg3[%c1024_8, %c0_9] : memref<1536x256xbf16, #tpu.memory_space<vmem>>, vector<512x256xbf16>
    %c0_10 = arith.constant 0 : index
    %c0_11 = arith.constant 0 : index
    %8 = vector.load %arg1[%c0_10, %c0_11] : memref<16x48xbf16, #tpu.memory_space<vmem>>, vector<16x48xbf16>
    %c0_12 = arith.constant 0 : index
    %c0_13 = arith.constant 0 : index
    %9 = vector.load %arg2[%c0_12, %c0_13] : memref<48x1024xbf16, #tpu.memory_space<vmem>>, vector<48x1024xbf16>
    %cst = arith.constant dense<0.000000e+00> : vector<16x1024xf32>
    %10 = tpu.matmul %8, %9, %cst {dimension_numbers = #tpu.dot_dimension_numbers<[1], [0], [0], [1], [0, 0, 1, 1], [], []>} : vector<16x48xbf16>, vector<48x1024xbf16>, vector<16x1024xf32> -> vector<16x1024xf32>
    %11 = vector.broadcast %0 : vector<1x1024xf32> to vector<16x1024xf32>
    %12 = arith.addf %10, %11 : vector<16x1024xf32>
    %cst_14 = arith.constant 0.000000e+00 : f32
    %13 = vector.broadcast %cst_14 : f32 to vector<16x1024xf32>
    %14 = arith.maximumf %12, %13 : vector<16x1024xf32>
    %15 = arith.truncf %14 : vector<16x1024xf32> to vector<16x1024xbf16>
    %16 = vector.extract_strided_slice %15 {offsets = [0, 0], sizes = [16, 512], strides = [1, 1]} : vector<16x1024xbf16> to vector<16x512xbf16>
    %cst_15 = arith.constant dense<0.000000e+00> : vector<16x256xf32>
    %17 = tpu.matmul %16, %5, %cst_15 {dimension_numbers = #tpu.dot_dimension_numbers<[1], [0], [0], [1], [0, 0, 1, 1], [], []>} : vector<16x512xbf16>, vector<512x256xbf16>, vector<16x256xf32> -> vector<16x256xf32>
    %18 = vector.broadcast %1 : vector<1x256xf32> to vector<16x256xf32>
    %19 = arith.addf %17, %18 : vector<16x256xf32>
    %cst_16 = arith.constant 0.000000e+00 : f32
    %20 = vector.broadcast %cst_16 : f32 to vector<16x256xf32>
    %21 = arith.maximumf %19, %20 : vector<16x256xf32>
    %22 = arith.truncf %21 : vector<16x256xf32> to vector<16x256xbf16>
    %23 = vector.extract_strided_slice %15 {offsets = [0, 512], sizes = [16, 512], strides = [1, 1]} : vector<16x1024xbf16> to vector<16x512xbf16>
    %cst_17 = arith.constant dense<0.000000e+00> : vector<16x256xf32>
    %24 = tpu.matmul %23, %6, %cst_17 {dimension_numbers = #tpu.dot_dimension_numbers<[1], [0], [0], [1], [0, 0, 1, 1], [], []>} : vector<16x512xbf16>, vector<512x256xbf16>, vector<16x256xf32> -> vector<16x256xf32>
    %25 = vector.broadcast %2 : vector<1x256xf32> to vector<16x256xf32>
    %26 = arith.addf %24, %25 : vector<16x256xf32>
    %cst_18 = arith.constant 0.000000e+00 : f32
    %27 = vector.broadcast %cst_18 : f32 to vector<16x256xf32>
    %28 = arith.maximumf %26, %27 : vector<16x256xf32>
    %29 = arith.truncf %28 : vector<16x256xf32> to vector<16x256xbf16>
    %30 = tpu.concatenate %22, %29 in 1 : vector<16x256xbf16>, vector<16x256xbf16> -> vector<16x512xbf16>
    %cst_19 = arith.constant dense<0.000000e+00> : vector<16x256xf32>
    %31 = tpu.matmul %30, %7, %cst_19 {dimension_numbers = #tpu.dot_dimension_numbers<[1], [0], [0], [1], [0, 0, 1, 1], [], []>} : vector<16x512xbf16>, vector<512x256xbf16>, vector<16x256xf32> -> vector<16x256xf32>
    %32 = vector.broadcast %3 : vector<1x256xf32> to vector<16x256xf32>
    %33 = arith.addf %31, %32 : vector<16x256xf32>
    %cst_20 = arith.constant 0.000000e+00 : f32
    %34 = vector.broadcast %cst_20 : f32 to vector<16x256xf32>
    %35 = arith.maximumf %33, %34 : vector<16x256xf32>
    %36 = arith.truncf %35 : vector<16x256xf32> to vector<16x256xbf16>
    %c0_21 = arith.constant 0 : index
    %c0_22 = arith.constant 0 : index
    %37 = vector.load %arg4[%c0_21, %c0_22] : memref<256x128xbf16, #tpu.memory_space<vmem>>, vector<256x128xbf16>
    %cst_23 = arith.constant dense<0.000000e+00> : vector<16x128xf32>
    %38 = tpu.matmul %36, %37, %cst_23 {dimension_numbers = #tpu.dot_dimension_numbers<[1], [0], [0], [1], [0, 0, 1, 1], [], []>} : vector<16x256xbf16>, vector<256x128xbf16>, vector<16x128xf32> -> vector<16x128xf32>
    %39 = vector.broadcast %4 : vector<1x128xf32> to vector<16x128xf32>
    %40 = arith.addf %38, %39 : vector<16x128xf32>
    %cst_24 = arith.constant dense<0xFF800000> : vector<16xf32>
    %41 = vector.multi_reduction <maximumf>, %40, %cst_24 [1] : vector<16x128xf32> to vector<16xf32>
    %42 = vector.shape_cast %41 : vector<16xf32> to vector<16x1xf32>
    %43 = vector.broadcast %42 : vector<16x1xf32> to vector<16x128xf32>
    %44 = arith.subf %40, %43 : vector<16x128xf32>
    %45 = math.exp %44 : vector<16x128xf32>
    %cst_25 = arith.constant dense<0.000000e+00> : vector<16xf32>
    %46 = vector.multi_reduction <add>, %45, %cst_25 [1] : vector<16x128xf32> to vector<16xf32>
    %47 = vector.shape_cast %46 : vector<16xf32> to vector<16x1xf32>
    %48 = tpu.reciprocal %47 {approx = true} : vector<16x1xf32> -> vector<16x1xf32>
    %49 = vector.broadcast %48 : vector<16x1xf32> to vector<16x128xf32>
    %50 = arith.mulf %45, %49 : vector<16x128xf32>
    %cst_26 = arith.constant 0.000000e+00 : f32
    %51 = vector.broadcast %cst_26 : f32 to vector<16x128xf32>
    %52 = arith.mulf %50, %51 : vector<16x128xf32>
    %53 = arith.truncf %52 : vector<16x128xf32> to vector<16x128xbf16>
    %c0_27 = arith.constant 0 : index
    %c0_28 = arith.constant 0 : index
    %54 = vector.load %arg6[%c0_27, %c0_28] : memref<16x128xbf16, #tpu.memory_space<vmem>>, vector<16x128xbf16>
    tpu.vector_store %arg6[%c0_27, %c0_28], %53 {strides = array<i32>} : memref<16x128xbf16, #tpu.memory_space<vmem>>, vector<16x128xbf16>,
    return
  }
  func.func @transform_0(%arg0: i32) -> (i32, i32) {
    %c0_i32 = arith.constant 0 : i32
    %c0_i32_0 = arith.constant 0 : i32
    return %arg0, %c0_i32 : i32, i32
  }
  func.func @transform_1(%arg0: i32) -> (i32, i32) {
    %c0_i32 = arith.constant 0 : i32
    %c0_i32_0 = arith.constant 0 : i32
    %c0_i32_1 = arith.constant 0 : i32
    return %c0_i32, %c0_i32_0 : i32, i32
  }
  func.func @transform_2(%arg0: i32) -> (i32, i32) {
    %c0_i32 = arith.constant 0 : i32
    %c0_i32_0 = arith.constant 0 : i32
    %c0_i32_1 = arith.constant 0 : i32
    return %c0_i32, %c0_i32_0 : i32, i32
  }
  func.func @transform_3(%arg0: i32) -> (i32, i32) {
    %c0_i32 = arith.constant 0 : i32
    %c0_i32_0 = arith.constant 0 : i32
    %c0_i32_1 = arith.constant 0 : i32
    return %c0_i32, %c0_i32_0 : i32, i32
  }
  func.func @transform_4(%arg0: i32) -> (i32, i32) {
    %c0_i32 = arith.constant 0 : i32
    %c0_i32_0 = arith.constant 0 : i32
    %c0_i32_1 = arith.constant 0 : i32
    return %c0_i32, %c0_i32_0 : i32, i32
  }
  func.func @transform_5(%arg0: i32) -> (i32, i32) {
    %c0_i32 = arith.constant 0 : i32
    %c0_i32_0 = arith.constant 0 : i32
    return %arg0, %c0_i32 : i32, i32
  }
}

</mosaic_0001>

<bundles_post_ra>
// kernel: tpu_custom_call.1
= control target key start
LH: loop header
LB: loop body
LE: loop exit
PB: predicated region body
PF: predicated region fallthrough
CT: control target
= control target key end

     0   :  { %10 = vsyncpa [#allocation3], 0  ;;  %s3076_s0 = inlined_call_operand.hbm [shape: bf16[16,48], index: 0, kind: input, shape index: {}]   ;;  %s3077_s1 = inlined_call_operand.hbm [shape: bf16[48,1024], index: 1, kind: input, shape index: {}]   ;;  %s3078_s2 = inlined_call_operand.hbm [shape: bf16[1536,256], index: 2, kind: input, shape index: {}]   ;;  %s3079_s3 = inlined_call_operand.hbm [shape: bf16[256,128], index: 3, kind: input, shape index: {}]   ;;  %s3080_s4 = inlined_call_operand.vmem [shape: f32[1,1920], index: 4, kind: input, shape index: {}]   ;;  %s3081_s5 = inlined_call_operand.hbm [shape: bf16[16,128], index: 5, kind: output, shape index: {}]  }
   0x1   :  { %11 = vsyncpa [#allocation6], 0 }
   0x2   :  { %12 = vsyncpa [#allocation9], 0 }
   0x3   :  { %13 = vsyncpa [#allocation4], 0  ;;  %s2895_s18 = smov [#allocation5]   ;;  %s2777_s22 = scalar_lea.hbm %s3077_s1, 3072 }
   0x4   :  { %s31_s19 = sshll.u32 %s2895_s18, 4  ;;  %p2778_p0 = scmp.ne.s32.totalorder %s3077_s1, %s2777_s22  ;;  %s32_s19 = int_to_ptr.vmem [resolvable:$true] %s31_s19 }
   0x5   :  { %p2781_p1 = scmp.lt.u32.totalorder %s2777_s22, %s3077_s1 }
   0x7   :  { %p2783_p2 = pnand %p2781_p1, %p2778_p0 }
   0x9   :  { %2786 = shalt.err (!%p2783_p2)
}
   0xa   :  { %s2787_s27 = scalar_lea.vmem %s32_s19, 3072  ;;  %p2792_p4 = scmp.lt.s32.totalorder %s32_s19, %s32_s19 }
   0xb   :  { %p2788_p3 = scmp.ne.s32.totalorder %s32_s19, %s2787_s27  ;;  %p2793_p5 = scmp.lt.s32.totalorder %s2787_s27, %s2787_s27 }
   0xd   :  { %p2794_p6 = por %p2793_p5, %p2792_p4 }
   0xf   :  { %p2795_p7 = pnand %p2794_p6, %p2788_p3 }
  0x11   :  { %2798 = shalt.err (!%p2795_p7)
}
  0x12   :  { %s2896_s28 = smov 512   ;;  %s2897_s29 = smov 32  }
  0x13   :  { %37 = dma.hbm_to_vmem [thread:$0]  %s3077_s1, 3072, %s32_s19, [#allocation6], %s2896_s28, %s2896_s28, %s2897_s29  }
  0x14   :  { %s2898_s7 = smov [#allocation2]   ;;  %s2799_s11 = scalar_lea.hbm %s3076_s0, 128 }
  0x15   :  { %s19_s8 = sshll.u32 %s2898_s7, 4  ;;  %p2800_p8 = scmp.ne.s32.totalorder %s3076_s0, %s2799_s11  ;;  %s20_s8 = int_to_ptr.vmem [resolvable:$true] %s19_s8 }
  0x16   :  { %p2803_p9 = scmp.lt.u32.totalorder %s2799_s11, %s3076_s0 }
  0x18   :  { %p2805_p10 = pnand %p2803_p9, %p2800_p8 }
  0x1a   :  { %2808 = shalt.err (!%p2805_p10)
}
  0x1b   :  { %s2809_s16 = scalar_lea.vmem %s20_s8, 128  ;;  %p2814_p12 = scmp.lt.s32.totalorder %s20_s8, %s20_s8 }
  0x1c   :  { %p2810_p11 = scmp.ne.s32.totalorder %s20_s8, %s2809_s16  ;;  %p2815_p13 = scmp.lt.s32.totalorder %s2809_s16, %s2809_s16 }
  0x1e   :  { %p2816_p0 = por %p2815_p13, %p2814_p12 }
  0x20   :  { %p2817_p1 = pnand %p2816_p0, %p2810_p11 }
  0x22   :  { %2820 = shalt.err (!%p2817_p1)
}
  0x23   :  { %s2899_s1 = smov 64   ;;  %s2900_s17 = smov 4  }
  0x24   :  { %25 = dma.hbm_to_vmem [thread:$0]  %s3076_s0, 128, %s20_s8, [#allocation3], %s2899_s1, %s2899_s1, %s2900_s17  }
  0x25   :  { %s2901_s20 = smov [#allocation7]   ;;  %s2821_s24 = scalar_lea.hbm %s3078_s2, 24576 }
  0x26   :  { %s43_s21 = sshll.u32 %s2901_s20, 4  ;;  %p2822_p2 = scmp.ne.s32.totalorder %s3078_s2, %s2821_s24  ;;  %s44_s21 = int_to_ptr.vmem [resolvable:$true] %s43_s21 }
  0x27   :  { %p2825_p3 = scmp.lt.u32.totalorder %s2821_s24, %s3078_s2 }
  0x29   :  { %p2827_p4 = pnand %p2825_p3, %p2822_p2 }
  0x2b   :  { %2830 = shalt.err (!%p2827_p4)
}
  0x2c   :  { %s2831_s29 = scalar_lea.vmem %s44_s21, 24576  ;;  %p2836_p6 = scmp.lt.s32.totalorder %s44_s21, %s44_s21 }
  0x2d   :  { %p2832_p5 = scmp.ne.s32.totalorder %s44_s21, %s2831_s29  ;;  %p2837_p7 = scmp.lt.s32.totalorder %s2831_s29, %s2831_s29 }
  0x2f   :  { %p2838_p8 = por %p2837_p7, %p2836_p6 }
  0x31   :  { %p2839_p9 = pnand %p2838_p8, %p2832_p5 }
  0x33   :  { %2842 = shalt.err (!%p2839_p9)
}
  0x34   :  { %s2902_s0 = smov 128   ;;  %s2903_s30 = smov 8  }
  0x35   :  { %49 = dma.hbm_to_vmem [thread:$0]  %s3078_s2, 24576, %s44_s21, [#allocation6], %s2902_s0, %s2902_s0, %s2903_s30  }
  0x36   :  { %s2904_s8 = smov [#allocation8]   ;;  %s2843_s12 = scalar_lea.hbm %s3079_s3, 2048 }
  0x37   :  { %s55_s9 = sshll.u32 %s2904_s8, 4  ;;  %p2844_p10 = scmp.ne.s32.totalorder %s3079_s3, %s2843_s12  ;;  %s56_s9 = int_to_ptr.vmem [resolvable:$true] %s55_s9 }
  0x38   :  { %p2847_p11 = scmp.lt.u32.totalorder %s2843_s12, %s3079_s3 }
  0x3a   :  { %p2849_p12 = pnand %p2847_p11, %p2844_p10 }
  0x3c   :  { %2852 = shalt.err (!%p2849_p12)
}
  0x3d   :  { %s2853_s18 = scalar_lea.vmem %s56_s9, 2048  ;;  %p2858_p0 = scmp.lt.s32.totalorder %s56_s9, %s56_s9 }
  0x3e   :  { %p2854_p13 = scmp.ne.s32.totalorder %s56_s9, %s2853_s18  ;;  %p2859_p1 = scmp.lt.s32.totalorder %s2853_s18, %s2853_s18 }
  0x40   :  { %p2860_p2 = por %p2859_p1, %p2858_p0 }
  0x42   :  { %p2861_p3 = pnand %p2860_p2, %p2854_p13 }
  0x44   :  { %2864 = shalt.err (!%p2861_p3)
}
  0x45   :  { %61 = dma.hbm_to_vmem [thread:$0]  %s3079_s3, 2048, %s56_s9, [#allocation9], %s2899_s1, %s2899_s1, %s2900_s17  }
  0x46   :  { %2887 = dma.done.wait [#allocation3], 128  }
  0x47   :  { %2888 = vsyncadd [#allocation3], 4294967168 }
  0x48   :  { %2889 = dma.done.wait [#allocation6], 27648  }
  0x49   :  { %2890 = vsyncadd [#allocation6], 4294939648 }
  0x4a   :  { %2891 = dma.done.wait [#allocation9], 2048  }
  0x4b   :  { %2892 = vsyncadd [#allocation9], 4294965248  ;;  %v2905_v0 = vmov 0   ;;  %v276_v1 = vld [vmem:[#allocation5] sm:$0xff]  ;;  %v277_v12 = vld [vmem:[#allocation5 + $0x8] sm:$0xff]  ;;  %vm466_vm0 = vcmask 392192  }
  0x4c   :  { %502 = vmatprep.mubr.bf16.mxu0 %v2905_v0  ;;  %631 = vmatprep.mubr.bf16.mxu1 %v2905_v0  ;;  %v280_v2 = vld [vmem:[#allocation5 + $0x20] sm:$0xff]  ;;  %v281_v13 = vld [vmem:[#allocation5 + $0x28] sm:$0xff]  ;;  %v279_v14 = vld [vmem:[#allocation5 + $0x18] sm:$0xff] }
  0x4d   :  { %v284_v3 = vld [vmem:[#allocation5 + $0x40] sm:$0xff]  ;;  %v2161_v4 = vcombine.high %v276_v1, %v280_v2  ;;  %v2160_v5 = vcombine.low %v276_v1, %v280_v2  ;;  %v283_v15 = vld [vmem:[#allocation5 + $0x38] sm:$0xff]  ;;  %v285_v18 = vld [vmem:[#allocation5 + $0x48] sm:$0xff]  ;;  %v2163_v23 = vcombine.high %v277_v12, %v281_v13  ;;  %v2162_v29 = vcombine.low %v277_v12, %v281_v13 }
  0x4e   :  { %v288_v6 = vld [vmem:[#allocation5 + $0x60] sm:$0xff]  ;;  %v287_v16 = vld [vmem:[#allocation5 + $0x58] sm:$0xff]  ;;  %v289_v19 = vld [vmem:[#allocation5 + $0x68] sm:$0xff]  ;;  %v2167_v20 = vcombine.high %v279_v14, %v283_v15  ;;  %v2166_v21 = vcombine.low %v279_v14, %v283_v15 }
  0x4f   :  { %v292_v7 = vld [vmem:[#allocation5 + $0x80] sm:$0xff]  ;;  %v2169_v8 = vcombine.high %v284_v3, %v288_v6  ;;  %470 = vmatprep.subr.bf16.mxu0 %v2161_v4  ;;  %v2168_v10 = vcombine.low %v284_v3, %v288_v6  ;;  %v291_v22 = vld [vmem:[#allocation5 + $0x78] sm:$0xff]  ;;  %v2171_v30 = vcombine.high %v285_v18, %v289_v19  ;;  %v293_v31 = vld [vmem:[#allocation5 + $0x88] sm:$0xff]  ;;  %v2170_v35 = vcombine.low %v285_v18, %v289_v19 }
  0x50   :  { %v296_v9 = vld [vmem:[#allocation5 + $0xa0] sm:$0xff]  ;;  %471 = vmatpush1.bf16.msra.mxu0 %v2160_v5  ;;  %v2175_v24 = vcombine.high %v287_v16, %v291_v22  ;;  %v295_v25 = vld [vmem:[#allocation5 + $0x98] sm:$0xff]  ;;  %599 = vmatprep.subr.bf16.mxu1 %v2167_v20  ;;  %v2174_v28 = vcombine.low %v287_v16, %v291_v22  ;;  %v297_v33 = vld [vmem:[#allocation5 + $0xa8] sm:$0xff] }
  0x51   :  { %472 = vmatprep.subr.bf16.mxu0 %v2169_v8  ;;  %v2177_v11 = vcombine.high %v292_v7, %v296_v9  ;;  %v2176_v17 = vcombine.low %v292_v7, %v296_v9  ;;  %v299_v26 = vld [vmem:[#allocation5 + $0xb8] sm:$0xff]  ;;  %600 = vmatpush1.bf16.msra.mxu1 %v2166_v21  ;;  %v2467_v36 = vld [vmem:[#allocation7 + $0x4] ss:$8 sps:$4 sm:$0xff]   ;;  %v2179_v37 = vcombine.high %v293_v31, %v297_v33  ;;  %v278_v38 = vld [vmem:[#allocation5 + $0x10] sm:$0xff] }
  0x52   :  { %v2993_v27 = vld [vmem:[#allocation2] sm:$0xff]   ;;  %601 = vmatprep.subr.bf16.mxu1 %v2175_v24  ;;  %v2183_v32 = vcombine.high %v295_v25, %v299_v26  ;;  %v2182_v34 = vcombine.low %v295_v25, %v299_v26  ;;  %v282_v39 = vld [vmem:[#allocation5 + $0x30] sm:$0xff]  ;;  %v2465_v40 = vld [vmem:[#allocation7] ss:$8 sps:$4 sm:$0xff]   ;;  %v2178_v41 = vcombine.low %v293_v31, %v297_v33 }
  0x53   :  { %v2470_v42 = vld [vmem:[#allocation7 + $0x14] ss:$8 sps:$4 sm:$0xff]   ;;  %v2165_v43 = vcombine.high %v278_v38, %v282_v39  ;;  %v2468_v46 = vld [vmem:[#allocation7 + $0x10] ss:$8 sps:$4 sm:$0xff]   ;;  %v2164_v47 = vcombine.low %v278_v38, %v282_v39  ;;  %v2473_v50 = vld [vmem:[#allocation7 + $0x24] ss:$8 sps:$4 sm:$0xff]  }
  0x54   :  { %473 = vmatpush1.bf16.msra.mxu0 %v2168_v10  ;;  %v286_v44 = vld [vmem:[#allocation5 + $0x50] sm:$0xff]  ;;  %v2471_v52 = vld [vmem:[#allocation7 + $0x20] ss:$8 sps:$4 sm:$0xff]   ;;  %v2482_v58 = vld [vmem:[#allocation7 + $0x44] ss:$8 sps:$4 sm:$0xff]  }
  0x55   :  { %474 = vmatprep.subr.bf16.mxu0 %v2177_v11  ;;  %602 = vmatpush1.bf16.msra.mxu1 %v2174_v28  ;;  %v290_v45 = vld [vmem:[#allocation5 + $0x70] sm:$0xff]  ;;  %v2479_v59 = vld [vmem:[#allocation7 + $0x104] ss:$8 sps:$4 sm:$0xff]   ;;  %v2480_v60 = vld [vmem:[#allocation7 + $0x40] ss:$8 sps:$4 sm:$0xff]  }
  0x56   :  { %603 = vmatprep.subr.bf16.mxu1 %v2183_v32  ;;  %v294_v48 = vld [vmem:[#allocation5 + $0x90] sm:$0xff]  ;;  %v2173_v49 = vcombine.high %v286_v44, %v290_v45  ;;  %v2172_v53 = vcombine.low %v286_v44, %v290_v45  ;;  %v2477_v61 = vld [vmem:[#allocation7 + $0x100] ss:$8 sps:$4 sm:$0xff]   ;;  %v2494_v2 = vld [vmem:[#allocation7 + $0x64] ss:$8 sps:$4 sm:$0xff]  }
  0x57   :  { %v298_v51 = vld [vmem:[#allocation5 + $0xb0] sm:$0xff]  ;;  %v2491_v3 = vld [vmem:[#allocation7 + $0x124] ss:$8 sps:$4 sm:$0xff]   ;;  %v2489_v4 = vld [vmem:[#allocation7 + $0x120] ss:$8 sps:$4 sm:$0xff]  }
  0x58   :  { %475 = vmatpush1.bf16.msra.mxu0 %v2176_v17  ;;  %v2476_v54 = vld [vmem:[#allocation7 + $0x34] ss:$8 sps:$4 sm:$0xff]   ;;  %v2181_v55 = vcombine.high %v294_v48, %v298_v51  ;;  %v2474_v56 = vld [vmem:[#allocation7 + $0x30] ss:$8 sps:$4 sm:$0xff]   ;;  %v2180_v57 = vcombine.low %v294_v48, %v298_v51  ;;  %v2492_v5 = vld [vmem:[#allocation7 + $0x60] ss:$8 sps:$4 sm:$0xff]   ;;  %v301_v51 = vlaneseq }
  0x59   :  { %513 = vmatprep.subr.bf16.mxu0 %v2163_v23  ;;  %604 = vmatpush1.bf16.msra.mxu1 %v2182_v34  ;;  %v2488_v62 = vld [vmem:[#allocation7 + $0x54] ss:$8 sps:$4 sm:$0xff]   ;;  %v2483_v1 = vld [vmem:[#allocation7 + $0x110] ss:$8 sps:$4 sm:$0xff]   ;;  %v2506_v10 = vld [vmem:[#allocation7 + $0x84] ss:$8 sps:$4 sm:$0xff]  }
  0x5a   :  { %997 = vmatprep.subr.bf16.mxu1 %v2467_v36  ;;  %v2485_v63 = vld [vmem:[#allocation7 + $0x114] ss:$8 sps:$4 sm:$0xff]   ;;  %v2498_v8 = vld [vmem:[#allocation7 + $0x70] ss:$8 sps:$4 sm:$0xff]   ;;  %v2503_v11 = vld [vmem:[#allocation7 + $0x144] ss:$8 sps:$4 sm:$0xff]  }
  0x5b   :  { %2184 = vmatmul.mubr.msk.bf16.vlgmr.msra.gmra.mrb[0].mxu0 %vm466_vm0, %v2993_v27  ;;  %v2500_v6 = vld [vmem:[#allocation7 + $0x74] ss:$8 sps:$4 sm:$0xff]   ;;  %v2495_v9 = vld [vmem:[#allocation7 + $0x130] ss:$8 sps:$4 sm:$0xff]   ;;  %v2504_v12 = vld [vmem:[#allocation7 + $0x80] ss:$8 sps:$4 sm:$0xff]  }
  0x5c   :  { %514 = vmatpush1.bf16.msra.mxu0 %v2162_v29  ;;  %545 = vmatprep.mubr.bf16.mxu0 %v2905_v0  ;;  %v2497_v7 = vld [vmem:[#allocation7 + $0x134] ss:$8 sps:$4 sm:$0xff]   ;;  %v2501_v13 = vld [vmem:[#allocation7 + $0x140] ss:$8 sps:$4 sm:$0xff]   ;;  %v2510_v16 = vld [vmem:[#allocation7 + $0x90] ss:$8 sps:$4 sm:$0xff]  }
  0x5d   :  { %515 = vmatprep.subr.bf16.mxu0 %v2171_v30  ;;  %2187 = vmatmul.mubr.msk.bf16.vlgmr.msra.gmra.mrb[0].mxu1 %vm466_vm0, %v2993_v27  ;;  %v2512_v14 = vld [vmem:[#allocation7 + $0x94] ss:$8 sps:$4 sm:$0xff]   ;;  %v2507_v17 = vld [vmem:[#allocation7 + $0x150] ss:$8 sps:$4 sm:$0xff]   ;;  %v2518_v18 = vld [vmem:[#allocation7 + $0xa4] ss:$8 sps:$4 sm:$0xff]  }
  0x5e   :  { %998 = vmatpush1.bf16.msra.mxu1 %v2465_v40  ;;  %v2509_v15 = vld [vmem:[#allocation7 + $0x154] ss:$8 sps:$4 sm:$0xff]   ;;  %v2515_v19 = vld [vmem:[#allocation7 + $0x164] ss:$8 sps:$4 sm:$0xff]   ;;  %v2516_v20 = vld [vmem:[#allocation7 + $0xa0] ss:$8 sps:$4 sm:$0xff]  }
  0x5f   :  { %999 = vmatprep.subr.bf16.mxu1 %v2470_v42  ;;  %v2513_v21 = vld [vmem:[#allocation7 + $0x160] ss:$8 sps:$4 sm:$0xff]   ;;  %v2524_v22 = vld [vmem:[#allocation7 + $0xb4] ss:$8 sps:$4 sm:$0xff]   ;;  %v2522_v24 = vld [vmem:[#allocation7 + $0xb0] ss:$8 sps:$4 sm:$0xff]  }
  0x60   :  { %516 = vmatpush1.bf16.msra.mxu0 %v2170_v35  ;;  %v2521_v23 = vld [vmem:[#allocation7 + $0x174] ss:$8 sps:$4 sm:$0xff]   ;;  %v2519_v25 = vld [vmem:[#allocation7 + $0x170] ss:$8 sps:$4 sm:$0xff]   ;;  %v2530_v26 = vld [vmem:[#allocation7 + $0xc4] ss:$8 sps:$4 sm:$0xff]  }
  0x61   :  { %517 = vmatprep.subr.bf16.mxu0 %v2179_v37  ;;  %v2528_v28 = vld [vmem:[#allocation7 + $0xc0] ss:$8 sps:$4 sm:$0xff]   ;;  %v2536_v30 = vld [vmem:[#allocation7 + $0xd4] ss:$8 sps:$4 sm:$0xff]   ;;  %v2534_v32 = vld [vmem:[#allocation7 + $0xd0] ss:$8 sps:$4 sm:$0xff]  }
  0x62   :  { %1000 = vmatpush1.bf16.msra.mxu1 %v2468_v46  ;;  %v2525_v29 = vld [vmem:[#allocation7 + $0x180] ss:$8 sps:$4 sm:$0xff]   ;;  %v2533_v31 = vld [vmem:[#allocation7 + $0x194] ss:$8 sps:$4 sm:$0xff]   ;;  %v2531_v33 = vld [vmem:[#allocation7 + $0x190] ss:$8 sps:$4 sm:$0xff]  }
  0x63   :  { %1001 = vmatprep.subr.bf16.mxu1 %v2473_v50  ;;  %v2539_v34 = vld [vmem:[#allocation7 + $0x1a4] ss:$8 sps:$4 sm:$0xff]   ;;  %v2537_v35 = vld [vmem:[#allocation7 + $0x1a0] ss:$8 sps:$4 sm:$0xff]   ;;  %v2545_v38 = vld [vmem:[#allocation7 + $0x1b4] ss:$8 sps:$4 sm:$0xff]  }
  0x64   :  { %518 = vmatpush1.bf16.msra.mxu0 %v2178_v41  ;;  %v2542_v36 = vld [vmem:[#allocation7 + $0xe4] ss:$8 sps:$4 sm:$0xff]   ;;  %v2540_v37 = vld [vmem:[#allocation7 + $0xe0] ss:$8 sps:$4 sm:$0xff]   ;;  %v2543_v39 = vld [vmem:[#allocation7 + $0x1b0] ss:$8 sps:$4 sm:$0xff]  }
  0x65   :  { %556 = vmatprep.subr.bf16.mxu0 %v2165_v43  ;;  %v2548_v40 = vld [vmem:[#allocation7 + $0xf4] ss:$8 sps:$4 sm:$0xff]   ;;  %v2546_v41 = vld [vmem:[#allocation7 + $0xf0] ss:$8 sps:$4 sm:$0xff]   ;;  %v2551_v42 = vld [vmem:[#allocation7 + $0x1c4] ss:$8 sps:$4 sm:$0xff]  }
  0x66   :  { %1002 = vmatpush1.bf16.msra.mxu1 %v2471_v52  ;;  %v2549_v43 = vld [vmem:[#allocation7 + $0x1c0] ss:$8 sps:$4 sm:$0xff]   ;;  %v2554_v44 = vld [vmem:[#allocation7 + $0x204] ss:$8 sps:$4 sm:$0xff]   ;;  %v2557_v45 = vld [vmem:[#allocation7 + $0x1d4] ss:$8 sps:$4 sm:$0xff]  }
  0x67   :  { %2185 = vmatmul.mubr.msk.bf16.vlgmr.msra.gmra.mrb[4].mxu0 %vm466_vm0, %v2993_v27  ;;  %1003 = vmatprep.subr.bf16.mxu1 %v2476_v54  ;;  %v2555_v46 = vld [vmem:[#allocation7 + $0x1d0] ss:$8 sps:$4 sm:$0xff]   ;;  %v2561_v48 = vld [vmem:[#allocation7 + $0x1e0] ss:$8 sps:$4 sm:$0xff]   ;;  %v3005_v52 = vshrl.u32 %v301_v51, 7 }
  0x68   :  { %557 = vmatpush1.bf16.msra.mxu0 %v2164_v47  ;;  %588 = vmatprep.mubr.bf16.mxu0 %v2905_v0  ;;  %v2486_v0 = vld [vmem:[#allocation7 + $0x50] ss:$8 sps:$4 sm:$0xff]   ;;  %v2563_v47 = vld [vmem:[#allocation7 + $0x1e4] ss:$8 sps:$4 sm:$0xff]  }
  0x69   :  { %558 = vmatprep.subr.bf16.mxu0 %v2173_v49  ;;  %v2569_v49 = vld [vmem:[#allocation7 + $0x1f4] ss:$8 sps:$4 sm:$0xff]   ;;  %v2567_v50 = vld [vmem:[#allocation7 + $0x1f0] ss:$8 sps:$4 sm:$0xff]   ;;  %v3013_v54 = vld [vmem:[%s3080_s4] sm:$0xff] }
  0x6a   :  { %1004 = vmatpush1.bf16.msra.mxu1 %v2474_v56 }
  0x6b   :  { %1005 = vmatprep.subr.bf16.mxu1 %v2482_v58 }
  0x6c   :  { %559 = vmatpush1.bf16.msra.mxu0 %v2172_v53  ;;  %v3008_v53 = vsub.s32 0, %v3005_v52 }
  0x6d   :  { %560 = vmatprep.subr.bf16.mxu0 %v2181_v55  ;;  %v3016_v55 = vsub.s32 1, %v3005_v52 }
  0x6e   :  { %1006 = vmatpush1.bf16.msra.mxu1 %v2480_v60  ;;  %v304_v56 = vrot.slane %v3013_v54, %v3008_v53 }
  0x6f   :  { %1007 = vmatprep.subr.bf16.mxu1 %v2488_v62  ;;  %v331_v62 = vsub.s32 7, %v3005_v52 }
  0x70   :  { %561 = vmatpush1.bf16.msra.mxu0 %v2180_v57  ;;  %v308_v57 = vrot.slane %v3013_v54, %v3016_v55 }
  0x71   :  { %1040 = vmatprep.subr.bf16.mxu0 %v2479_v59  ;;  %v327_v59 = vsub.s32 6, %v3005_v52 }
  0x72   :  { %1008 = vmatpush1.bf16.msra.mxu1 %v2486_v0 }
  0x73   :  { %2186 = vmatmul.mubr.msk.bf16.vlgmr.msra.gmra.mrb[8].mxu0 %vm466_vm0, %v2993_v27  ;;  %1009 = vmatprep.subr.bf16.mxu1 %v2494_v2  ;;  %v2527_v27 = vld [vmem:[#allocation7 + $0x184] ss:$8 sps:$4 sm:$0xff]  }
  0x74   :  { %1041 = vmatpush1.bf16.msra.mxu0 %v2477_v61 }
  0x75   :  { %1042 = vmatprep.subr.bf16.mxu0 %v2485_v63 }
  0x76   :  { %1010 = vmatpush1.bf16.msra.mxu1 %v2492_v5 }
  0x77   :  { %1011 = vmatprep.subr.bf16.mxu1 %v2500_v6 }
  0x78   :  { %1043 = vmatpush1.bf16.msra.mxu0 %v2483_v1 }
  0x79   :  { %1044 = vmatprep.subr.bf16.mxu0 %v2491_v3 }
  0x7a   :  { %1012 = vmatpush1.bf16.msra.mxu1 %v2498_v8  ;;  %v332_v8 = vrot.slane %v3013_v54, %v331_v62 }
  0x7b   :  { %1013 = vmatprep.subr.bf16.mxu1 %v2506_v10 }
  0x7c   :  { %1045 = vmatpush1.bf16.msra.mxu0 %v2489_v4  ;;  %v328_v4 = vrot.slane %v3013_v54, %v327_v59  ;;  %v2575_v59 = vld [vmem:[#allocation7 + $0x244] ss:$8 sps:$4 sm:$0xff]  }
  0x7d   :  { %1046 = vmatprep.subr.bf16.mxu0 %v2497_v7  ;;  %v311_v7 = vsub.s32 2, %v3005_v52 }
  0x7e   :  { %1014 = vmatpush1.bf16.msra.mxu1 %v2504_v12 }
  0x7f   :  { %1015 = vmatprep.subr.bf16.mxu1 %v2512_v14 }
  0x80   :  { %1047 = vmatpush1.bf16.msra.mxu0 %v2495_v9 }
  0x81   :  { %1048 = vmatprep.subr.bf16.mxu0 %v2503_v11  ;;  %v315_v11 = vsub.s32 3, %v3005_v52 }
  0x82   :  { %1016 = vmatpush1.bf16.msra.mxu1 %v2510_v16 }
  0x83   :  { %1017 = vmatprep.subr.bf16.mxu1 %v2518_v18  ;;  %v312_v18 = vrot.slane %v3013_v54, %v311_v7 }
  0x84   :  { %1049 = vmatpush1.bf16.msra.mxu0 %v2501_v13 }
  0x85   :  { %1050 = vmatprep.subr.bf16.mxu0 %v2509_v15  ;;  %v2552_v15 = vld [vmem:[#allocation7 + $0x200] ss:$8 sps:$4 sm:$0xff]  }
  0x86   :  { %1018 = vmatpush1.bf16.msra.mxu1 %v2516_v20 }
  0x87   :  { %1019 = vmatprep.subr.bf16.mxu1 %v2524_v22  ;;  %v316_v22 = vrot.slane %v3013_v54, %v315_v11 }
  0x88   :  { %1051 = vmatpush1.bf16.msra.mxu0 %v2507_v17 }
  0x89   :  { %1052 = vmatprep.subr.bf16.mxu0 %v2515_v19  ;;  %v2560_v19 = vld [vmem:[#allocation7 + $0x214] ss:$8 sps:$4 sm:$0xff]  }
  0x8a   :  { %1020 = vmatpush1.bf16.msra.mxu1 %v2522_v24 }
  0x8b   :  { %1021 = vmatprep.subr.bf16.mxu1 %v2530_v26 }
  0x8c   :  { %1053 = vmatpush1.bf16.msra.mxu0 %v2513_v21 }
  0x8d   :  { %1054 = vmatprep.subr.bf16.mxu0 %v2521_v23 }
  0x8e   :  { %1022 = vmatpush1.bf16.msra.mxu1 %v2528_v28  ;;  %v2659_v28 = vld [vmem:[#allocation7 + $0x404] ss:$8 sps:$4 sm:$0xff]  }
  0x8f   :  { %1023 = vmatprep.subr.bf16.mxu1 %v2536_v30  ;;  %v2558_v30 = vld [vmem:[#allocation7 + $0x210] ss:$8 sps:$4 sm:$0xff]  }
  0x90   :  { %1055 = vmatpush1.bf16.msra.mxu0 %v2519_v25 }
  0x91   :  { %1056 = vmatprep.subr.bf16.mxu0 %v2527_v27 }
  0x92   :  { %1024 = vmatpush1.bf16.msra.mxu1 %v2534_v32 }
  0x93   :  { %1025 = vmatprep.subr.bf16.mxu1 %v2542_v36 }
  0x94   :  { %1057 = vmatpush1.bf16.msra.mxu0 %v2525_v29 }
  0x95   :  { %1058 = vmatprep.subr.bf16.mxu0 %v2533_v31 }
  0x96   :  { %1026 = vmatpush1.bf16.msra.mxu1 %v2540_v37 }
  0x97   :  { %1027 = vmatprep.subr.bf16.mxu1 %v2548_v40 }
  0x98   :  { %1059 = vmatpush1.bf16.msra.mxu0 %v2531_v33 }
  0x99   :  { %1060 = vmatprep.subr.bf16.mxu0 %v2539_v34  ;;  %v2566_v34 = vld [vmem:[#allocation7 + $0x224] ss:$8 sps:$4 sm:$0xff]  }
  0x9a   :  { %1028 = vmatpush1.bf16.msra.mxu1 %v2546_v41 }
  0x9b   :  { %1420 = vmatprep.subr.bf16.mxu1 %v2554_v44 }
  0x9c   :  { %1061 = vmatpush1.bf16.msra.mxu0 %v2537_v35 }
  0x9d   :  { %1062 = vmatprep.subr.bf16.mxu0 %v2545_v38 }
  0xa0   :  { %1063 = vmatpush1.bf16.msra.mxu0 %v2543_v39 }
  0xa1   :  { %1064 = vmatprep.subr.bf16.mxu0 %v2551_v42 }
  0xa4   :  { %1065 = vmatpush1.bf16.msra.mxu0 %v2549_v43 }
  0xa5   :  { %1066 = vmatprep.subr.bf16.mxu0 %v2557_v45  ;;  %v2564_v45 = vld [vmem:[#allocation7 + $0x220] ss:$8 sps:$4 sm:$0xff]  }
  0xa8   :  { %1067 = vmatpush1.bf16.msra.mxu0 %v2555_v46 }
  0xa9   :  { %1068 = vmatprep.subr.bf16.mxu0 %v2563_v47  ;;  %v2572_v47 = vld [vmem:[#allocation7 + $0x234] ss:$8 sps:$4 sm:$0xff]  }
  0xac   :  { %1069 = vmatpush1.bf16.msra.mxu0 %v2561_v48  ;;  %v319_v48 = vsub.s32 4, %v3005_v52 }
  0xad   :  { %1070 = vmatprep.subr.bf16.mxu0 %v2569_v49 }
  0xb0   :  { %1071 = vmatpush1.bf16.msra.mxu0 %v2567_v50  ;;  %v323_v50 = vsub.s32 5, %v3005_v52  ;;  %v2578_v52 = vld [vmem:[#allocation7 + $0x254] ss:$8 sps:$4 sm:$0xff]  }
  0xb1   :  { %1843 = vmatprep.subr.bf16.mxu0 %v2659_v28  ;;  %v2672_v28 = vld [vmem:[#allocation7 + $0x450] ss:$8 sps:$4 sm:$0xff]  }
  0xb2   :  { %v324_v62 = vrot.slane %v3013_v54, %v323_v50  ;;  %v2687_v50 = vld [vmem:[#allocation7 + $0x4a0] ss:$8 sps:$4 sm:$0xff]  }
 0x12e   :  { %v504_v58 = vpop.f32.mrb[0].mxu0 }
 0x12f   :  { %v505_v60 = vadd.f32 %v504_v58, %v304_v56  ;;  %v506_v61 = vpop.f32.mrb[1].mxu0  ;;  %v2657_v58 = vld [vmem:[#allocation7 + $0x400] ss:$8 sps:$4 sm:$0xff]  }
 0x130   :  { %v507_v63 = vadd.f32 %v506_v61, %v308_v57  ;;  %v508_v0 = vpop.f32.mrb[2].mxu0  ;;  %v633_v13 = vpop.f32.mrb[0].mxu1  ;;  %v2662_v61 = vld [vmem:[#allocation7 + $0x414] ss:$8 sps:$4 sm:$0xff]  }
 0x131   :  { %v509_v1 = vadd.f32 %v508_v0, %v304_v56  ;;  %v510_v2 = vpop.f32.mrb[3].mxu0  ;;  %v642_v5 = vmax.f32 %v505_v60, 0.0  ;;  %v634_v16 = vadd.f32 %v633_v13, %v328_v4  ;;  %v635_v17 = vpop.f32.mrb[1].mxu1  ;;  %v320_v60 = vrot.slane %v3013_v54, %v319_v48  ;;  %v2581_v13 = vld [vmem:[#allocation7 + $0x264] ss:$8 sps:$4 sm:$0xff]  }
 0x132   :  { %v511_v3 = vadd.f32 %v510_v2, %v308_v57  ;;  %v643_v9 = vmax.f32 %v507_v63, 0.0  ;;  %v636_v20 = vadd.f32 %v635_v17, %v332_v8  ;;  %v637_v21 = vpop.f32.mrb[2].mxu1  ;;  %v2570_v57 = vld [vmem:[#allocation7 + $0x230] ss:$8 sps:$4 sm:$0xff]   ;;  %v2573_v63 = vld [vmem:[#allocation7 + $0x240] ss:$8 sps:$4 sm:$0xff]  }
 0x133   :  { %v650_v6 = vmax.f32 %v509_v1, 0.0  ;;  %v648_v23 = vmax.f32 %v634_v16, 0.0  ;;  %v638_v24 = vadd.f32 %v637_v21, %v328_v4  ;;  %v639_v25 = vpop.f32.mrb[3].mxu1  ;;  %v2660_v1 = vld [vmem:[#allocation7 + $0x410] ss:$8 sps:$4 sm:$0xff]  }
 0x134   :  { %v651_v10 = vmax.f32 %v511_v3, 0.0  ;;  %v649_v26 = vmax.f32 %v636_v20, 0.0  ;;  %v640_v27 = vadd.f32 %v639_v25, %v332_v8  ;;  %v2665_v4 = vld [vmem:[#allocation7 + $0x424] ss:$8 sps:$4 sm:$0xff]   ;;  %v2666_v20 = vld [vmem:[#allocation7 + $0x430] ss:$8 sps:$4 sm:$0xff]  }
 0x135   :  { %v658_v12 = vpack.c.bf16 %v650_v6, %v642_v5  ;;  %v656_v31 = vmax.f32 %v638_v24, 0.0  ;;  %v2584_v21 = vld [vmem:[#allocation7 + $0x274] ss:$8 sps:$4 sm:$0xff]   ;;  %v2669_v24 = vld [vmem:[#allocation7 + $0x440] ss:$8 sps:$4 sm:$0xff]  }
 0x136   :  { %v659_v14 = vpack.c.bf16 %v651_v10, %v643_v9  ;;  %v657_v35 = vmax.f32 %v640_v27, 0.0  ;;  %v2576_v10 = vld [vmem:[#allocation7 + $0x250] ss:$8 sps:$4 sm:$0xff]   ;;  %v2587_v25 = vld [vmem:[#allocation7 + $0x284] ss:$8 sps:$4 sm:$0xff]  }
 0x137   :  { %v3030_v38 = vpack.c.bf16 %v656_v31, %v648_v23  ;;  %v2582_v23 = vld [vmem:[#allocation7 + $0x270] ss:$8 sps:$4 sm:$0xff]   ;;  %v2585_v27 = vld [vmem:[#allocation7 + $0x280] ss:$8 sps:$4 sm:$0xff]   ;;  %v2689_v48 = vld [vmem:[#allocation7 + $0x4a4] ss:$8 sps:$4 sm:$0xff]  }
 0x138   :  { %1029 = vmatprep.mubr.bf16.mxu1 %v659_v14  ;;  %v3032_v42 = vpack.c.bf16 %v657_v35, %v649_v26  ;;  %v2674_v26 = vld [vmem:[#allocation7 + $0x454] ss:$8 sps:$4 sm:$0xff]   ;;  %v2588_v31 = vld [vmem:[#allocation7 + $0x290] ss:$8 sps:$4 sm:$0xff]   ;;  %v2591_v35 = vld [vmem:[#allocation7 + $0x2a0] ss:$8 sps:$4 sm:$0xff]  }
 0x139   :  { %1030 = vmatmul.mubr.bf16.vlgmr.msra.gmra.mrb[4].mxu1 %v658_v12  ;;  %v2663_v12 = vld [vmem:[#allocation7 + $0x420] ss:$8 sps:$4 sm:$0xff]  }
 0x13a   :  { %1421 = vmatpush1.bf16.msra.mxu1 %v2552_v15  ;;  %v547_v29 = vpop.f32.mrb[4].mxu0  ;;  %v2668_v15 = vld [vmem:[#allocation7 + $0x434] ss:$8 sps:$4 sm:$0xff]  }
 0x13b   :  { %v548_v32 = vadd.f32 %v547_v29, %v312_v18  ;;  %v549_v33 = vpop.f32.mrb[5].mxu0  ;;  %1422 = vmatprep.subr.bf16.mxu1 %v2560_v19  ;;  %v2590_v29 = vld [vmem:[#allocation7 + $0x294] ss:$8 sps:$4 sm:$0xff]  }
 0x13c   :  { %v550_v36 = vadd.f32 %v549_v33, %v316_v22  ;;  %v551_v37 = vpop.f32.mrb[6].mxu0  ;;  %v2593_v33 = vld [vmem:[#allocation7 + $0x2a4] ss:$8 sps:$4 sm:$0xff]  }
 0x13d   :  { %v644_v39 = vmax.f32 %v548_v32, 0.0  ;;  %v552_v40 = vadd.f32 %v551_v37, %v312_v18  ;;  %v553_v41 = vpop.f32.mrb[7].mxu0  ;;  %v2579_v18 = vld [vmem:[#allocation7 + $0x260] ss:$8 sps:$4 sm:$0xff]   ;;  %v2596_v37 = vld [vmem:[#allocation7 + $0x2b4] ss:$8 sps:$4 sm:$0xff]  }
 0x13e   :  { %v645_v43 = vmax.f32 %v550_v36, 0.0  ;;  %v554_v44 = vadd.f32 %v553_v41, %v316_v22  ;;  %1423 = vmatpush1.bf16.msra.mxu1 %v2558_v30  ;;  %v2671_v22 = vld [vmem:[#allocation7 + $0x444] ss:$8 sps:$4 sm:$0xff]   ;;  %v2675_v32 = vld [vmem:[#allocation7 + $0x460] ss:$8 sps:$4 sm:$0xff]  }
 0x13f   :  { %v652_v46 = vmax.f32 %v552_v40, 0.0  ;;  %1424 = vmatprep.subr.bf16.mxu1 %v2566_v34  ;;  %v2677_v30 = vld [vmem:[#allocation7 + $0x464] ss:$8 sps:$4 sm:$0xff]   ;;  %v2680_v34 = vld [vmem:[#allocation7 + $0x474] ss:$8 sps:$4 sm:$0xff]  }
 0x140   :  { %v653_v49 = vmax.f32 %v554_v44, 0.0  ;;  %v2678_v36 = vld [vmem:[#allocation7 + $0x470] ss:$8 sps:$4 sm:$0xff]   ;;  %v2681_v41 = vld [vmem:[#allocation7 + $0x480] ss:$8 sps:$4 sm:$0xff]  }
 0x141   :  { %v660_v51 = vpack.c.bf16 %v652_v46, %v644_v39  ;;  %v2683_v39 = vld [vmem:[#allocation7 + $0x484] ss:$8 sps:$4 sm:$0xff]   ;;  %v2594_v40 = vld [vmem:[#allocation7 + $0x2b0] ss:$8 sps:$4 sm:$0xff]   ;;  %v2686_v44 = vld [vmem:[#allocation7 + $0x494] ss:$8 sps:$4 sm:$0xff]  }
 0x142   :  { %v661_v56 = vpack.c.bf16 %v653_v49, %v645_v43  ;;  %1425 = vmatpush1.bf16.msra.mxu1 %v2564_v45  ;;  %v2599_v43 = vld [vmem:[#allocation7 + $0x2c4] ss:$8 sps:$4 sm:$0xff]   ;;  %v2597_v45 = vld [vmem:[#allocation7 + $0x2c0] ss:$8 sps:$4 sm:$0xff]   ;;  %v2684_v46 = vld [vmem:[#allocation7 + $0x490] ss:$8 sps:$4 sm:$0xff]  }
 0x143   :  { %1426 = vmatprep.subr.bf16.mxu1 %v2572_v47  ;;  %v2602_v47 = vld [vmem:[#allocation7 + $0x2d4] ss:$8 sps:$4 sm:$0xff]   ;;  %v2600_v49 = vld [vmem:[#allocation7 + $0x2d0] ss:$8 sps:$4 sm:$0xff]  }
 0x144   :  { %1072 = vmatprep.mubr.bf16.mxu0 %v661_v56  ;;  %v2603_v56 = vld [vmem:[#allocation7 + $0x2e0] ss:$8 sps:$4 sm:$0xff]  }
 0x145   :  { %1073 = vmatmul.mubr.bf16.vlgmr.msra.gmra.mrb[12].mxu0 %v660_v51  ;;  %v2605_v51 = vld [vmem:[#allocation7 + $0x2e4] ss:$8 sps:$4 sm:$0xff]  }
 0x146   :  { %1427 = vmatpush1.bf16.msra.mxu1 %v2570_v57  ;;  %v590_v0 = vpop.f32.mrb[8].mxu0  ;;  %1844 = vmatpush1.bf16.msra.mxu0 %v2657_v58  ;;  %v2608_v57 = vld [vmem:[#allocation7 + $0x2f4] ss:$8 sps:$4 sm:$0xff]   ;;  %v2606_v58 = vld [vmem:[#allocation7 + $0x2f0] ss:$8 sps:$4 sm:$0xff]  }
 0x147   :  { %1428 = vmatprep.subr.bf16.mxu1 %v2575_v59  ;;  %v591_v2 = vadd.f32 %v590_v0, %v320_v60  ;;  %v592_v3 = vpop.f32.mrb[9].mxu0  ;;  %1845 = vmatprep.subr.bf16.mxu0 %v2662_v61  ;;  %v2611_v59 = vld [vmem:[#allocation7 + $0x304] ss:$8 sps:$4 sm:$0xff]   ;;  %v2614_v61 = vld [vmem:[#allocation7 + $0x314] ss:$8 sps:$4 sm:$0xff]  }
 0x148   :  { %v593_v5 = vadd.f32 %v592_v3, %v324_v62  ;;  %v594_v6 = vpop.f32.mrb[10].mxu0  ;;  %v2615_v0 = vld [vmem:[#allocation7 + $0x320] ss:$8 sps:$4 sm:$0xff]  }
 0x149   :  { %v646_v7 = vmax.f32 %v591_v2, 0.0  ;;  %v595_v8 = vadd.f32 %v594_v6, %v320_v60  ;;  %v596_v9 = vpop.f32.mrb[11].mxu0  ;;  %v2609_v60 = vld [vmem:[#allocation7 + $0x300] ss:$8 sps:$4 sm:$0xff]   ;;  %v2623_v2 = vld [vmem:[#allocation7 + $0x344] ss:$8 sps:$4 sm:$0xff]  }
 0x14a   :  { %1429 = vmatpush1.bf16.msra.mxu1 %v2573_v63  ;;  %v647_v54 = vmax.f32 %v593_v5, 0.0  ;;  %v597_v11 = vadd.f32 %v596_v9, %v324_v62  ;;  %1846 = vmatpush1.bf16.msra.mxu0 %v2660_v1  ;;  %v2612_v62 = vld [vmem:[#allocation7 + $0x310] ss:$8 sps:$4 sm:$0xff]   ;;  %v2617_v63 = vld [vmem:[#allocation7 + $0x324] ss:$8 sps:$4 sm:$0xff]  }
 0x14b   :  { %1430 = vmatprep.subr.bf16.mxu1 %v2578_v52  ;;  %v654_v14 = vmax.f32 %v595_v8, 0.0  ;;  %1847 = vmatprep.subr.bf16.mxu0 %v2665_v4  ;;  %v2620_v1 = vld [vmem:[#allocation7 + $0x334] ss:$8 sps:$4 sm:$0xff]   ;;  %v2618_v52 = vld [vmem:[#allocation7 + $0x330] ss:$8 sps:$4 sm:$0xff]  }
 0x14c   :  { %v655_v16 = vmax.f32 %v597_v11, 0.0  ;;  %v2621_v3 = vld [vmem:[#allocation7 + $0x340] ss:$8 sps:$4 sm:$0xff]   ;;  %v2626_v4 = vld [vmem:[#allocation7 + $0x354] ss:$8 sps:$4 sm:$0xff]  }
 0x14d   :  { %v3038_v17 = vpack.c.bf16 %v654_v14, %v646_v7  ;;  %v2624_v5 = vld [vmem:[#allocation7 + $0x350] ss:$8 sps:$4 sm:$0xff]   ;;  %v2629_v6 = vld [vmem:[#allocation7 + $0x364] ss:$8 sps:$4 sm:$0xff]   ;;  %v2692_v7 = vld [vmem:[#allocation7 + $0x4b4] ss:$8 sps:$4 sm:$0xff]  }
 0x14e   :  { %1431 = vmatpush1.bf16.msra.mxu1 %v2576_v10  ;;  %v663_v19 = vpack.c.bf16 %v655_v16, %v647_v54  ;;  %1848 = vmatpush1.bf16.msra.mxu0 %v2663_v12  ;;  %v2632_v8 = vld [vmem:[#allocation7 + $0x374] ss:$8 sps:$4 sm:$0xff]   ;;  %v2690_v9 = vld [vmem:[#allocation7 + $0x4b0] ss:$8 sps:$4 sm:$0xff]   ;;  %v2695_v10 = vld [vmem:[#allocation7 + $0x4c4] ss:$8 sps:$4 sm:$0xff]  }
 0x14f   :  { %1432 = vmatprep.subr.bf16.mxu1 %v2581_v13  ;;  %1849 = vmatprep.subr.bf16.mxu0 %v2668_v15  ;;  %v2693_v54 = vld [vmem:[#allocation7 + $0x4c0] ss:$8 sps:$4 sm:$0xff]   ;;  %v2630_v11 = vld [vmem:[#allocation7 + $0x370] ss:$8 sps:$4 sm:$0xff]   ;;  %v2698_v12 = vld [vmem:[#allocation7 + $0x4d4] ss:$8 sps:$4 sm:$0xff]  }
 0x150   :  { %1452 = vmatprep.mubr.bf16.mxu1 %v663_v19  ;;  %v2635_v13 = vld [vmem:[#allocation7 + $0x384] ss:$8 sps:$4 sm:$0xff]   ;;  %v2696_v14 = vld [vmem:[#allocation7 + $0x4d0] ss:$8 sps:$4 sm:$0xff]   ;;  %v2633_v15 = vld [vmem:[#allocation7 + $0x380] ss:$8 sps:$4 sm:$0xff]  }
 0x151   :  { %v2638_v16 = vld [vmem:[#allocation7 + $0x394] ss:$8 sps:$4 sm:$0xff]   ;;  %v2641_v19 = vld [vmem:[#allocation7 + $0x3a4] ss:$8 sps:$4 sm:$0xff]  }
 0x152   :  { %1433 = vmatpush1.bf16.msra.mxu1 %v2579_v18  ;;  %1850 = vmatpush1.bf16.msra.mxu0 %v2666_v20  ;;  %v2701_v18 = vld [vmem:[#allocation7 + $0x4e4] ss:$8 sps:$4 sm:$0xff]   ;;  %v2699_v20 = vld [vmem:[#allocation7 + $0x4e0] ss:$8 sps:$4 sm:$0xff]  }
 0x153   :  { %1434 = vmatprep.subr.bf16.mxu1 %v2584_v21  ;;  %1851 = vmatprep.subr.bf16.mxu0 %v2671_v22  ;;  %v2639_v21 = vld [vmem:[#allocation7 + $0x3a0] ss:$8 sps:$4 sm:$0xff]   ;;  %v2704_v22 = vld [vmem:[#allocation7 + $0x4f4] ss:$8 sps:$4 sm:$0xff]  }
 0x156   :  { %1435 = vmatpush1.bf16.msra.mxu1 %v2582_v23  ;;  %1852 = vmatpush1.bf16.msra.mxu0 %v2669_v24  ;;  %v2644_v23 = vld [vmem:[#allocation7 + $0x3b4] ss:$8 sps:$4 sm:$0xff]   ;;  %v2702_v24 = vld [vmem:[#allocation7 + $0x4f0] ss:$8 sps:$4 sm:$0xff]  }
 0x157   :  { %1436 = vmatprep.subr.bf16.mxu1 %v2587_v25  ;;  %1853 = vmatprep.subr.bf16.mxu0 %v2674_v26  ;;  %v2642_v25 = vld [vmem:[#allocation7 + $0x3b0] ss:$8 sps:$4 sm:$0xff]   ;;  %v2647_v26 = vld [vmem:[#allocation7 + $0x3c4] ss:$8 sps:$4 sm:$0xff]  }
 0x15a   :  { %1437 = vmatpush1.bf16.msra.mxu1 %v2585_v27  ;;  %1854 = vmatpush1.bf16.msra.mxu0 %v2672_v28  ;;  %v2707_v27 = vld [vmem:[#allocation7 + $0x504] ss:$8 sps:$4 sm:$0xff]   ;;  %v2645_v28 = vld [vmem:[#allocation7 + $0x3c0] ss:$8 sps:$4 sm:$0xff]  }
 0x15b   :  { %1438 = vmatprep.subr.bf16.mxu1 %v2590_v29  ;;  %1855 = vmatprep.subr.bf16.mxu0 %v2677_v30  ;;  %v2650_v29 = vld [vmem:[#allocation7 + $0x3d4] ss:$8 sps:$4 sm:$0xff]   ;;  %v2648_v30 = vld [vmem:[#allocation7 + $0x3d0] ss:$8 sps:$4 sm:$0xff]  }
 0x15e   :  { %1439 = vmatpush1.bf16.msra.mxu1 %v2588_v31  ;;  %1856 = vmatpush1.bf16.msra.mxu0 %v2675_v32  ;;  %v2653_v31 = vld [vmem:[#allocation7 + $0x3e4] ss:$8 sps:$4 sm:$0xff]   ;;  %v2651_v32 = vld [vmem:[#allocation7 + $0x3e0] ss:$8 sps:$4 sm:$0xff]  }
 0x15f   :  { %1440 = vmatprep.subr.bf16.mxu1 %v2593_v33  ;;  %1857 = vmatprep.subr.bf16.mxu0 %v2680_v34  ;;  %v2656_v33 = vld [vmem:[#allocation7 + $0x3f4] ss:$8 sps:$4 sm:$0xff]   ;;  %v2654_v34 = vld [vmem:[#allocation7 + $0x3f0] ss:$8 sps:$4 sm:$0xff]  }
 0x162   :  { %1441 = vmatpush1.bf16.msra.mxu1 %v2591_v35  ;;  %1858 = vmatpush1.bf16.msra.mxu0 %v2678_v36 }
 0x163   :  { %1442 = vmatprep.subr.bf16.mxu1 %v2596_v37  ;;  %1859 = vmatprep.subr.bf16.mxu0 %v2683_v39 }
 0x166   :  { %1443 = vmatpush1.bf16.msra.mxu1 %v2594_v40  ;;  %1860 = vmatpush1.bf16.msra.mxu0 %v2681_v41  ;;  %v78_v40 = vld [vmem:[%s3080_s4 + $0x8] sm:$0x3] }
 0x167   :  { %1444 = vmatprep.subr.bf16.mxu1 %v2599_v43  ;;  %1861 = vmatprep.subr.bf16.mxu0 %v2686_v44  ;;  %v670_v41 = vrot.slane %v78_v40, %v3008_v53  ;;  %v674_v43 = vrot.slane %v78_v40, %v3016_v55  ;;  %v2750_v40 = vld [vmem:[#allocation7 + $0x5f0] ss:$8 sps:$4 sm:$0xff]  }
 0x16a   :  { %1445 = vmatpush1.bf16.msra.mxu1 %v2597_v45  ;;  %1862 = vmatpush1.bf16.msra.mxu0 %v2684_v46  ;;  %v2753_v45 = vld [vmem:[#allocation8 + $0x40] sm:$0xff]  }
 0x16b   :  { %1446 = vmatprep.subr.bf16.mxu1 %v2602_v47  ;;  %1863 = vmatprep.subr.bf16.mxu0 %v2689_v48  ;;  %v2754_v46 = vld [vmem:[#allocation8] sm:$0xff]   ;;  %v2755_v47 = vld [vmem:[#allocation8 + $0x48] sm:$0xff]  }
 0x16e   :  { %1447 = vmatpush1.bf16.msra.mxu1 %v2600_v49  ;;  %1864 = vmatpush1.bf16.msra.mxu0 %v2687_v50 }
 0x16f   :  { %1448 = vmatprep.subr.bf16.mxu1 %v2605_v51  ;;  %1865 = vmatprep.subr.bf16.mxu0 %v2692_v7  ;;  %v2710_v7 = vld [vmem:[#allocation7 + $0x514] ss:$8 sps:$4 sm:$0xff]  }
 0x172   :  { %1449 = vmatpush1.bf16.msra.mxu1 %v2603_v56  ;;  %1866 = vmatpush1.bf16.msra.mxu0 %v2690_v9  ;;  %v2761_v9 = vld [vmem:[#allocation8 + $0x60] sm:$0xff]  }
 0x173   :  { %1450 = vmatprep.subr.bf16.mxu1 %v2608_v57  ;;  %1867 = vmatprep.subr.bf16.mxu0 %v2695_v10  ;;  %v2708_v10 = vld [vmem:[#allocation7 + $0x510] ss:$8 sps:$4 sm:$0xff]  }
 0x176   :  { %1451 = vmatpush1.bf16.msra.mxu1 %v2606_v58  ;;  %1868 = vmatpush1.bf16.msra.mxu0 %v2693_v54  ;;  %v2713_v54 = vld [vmem:[#allocation7 + $0x524] ss:$8 sps:$4 sm:$0xff]  }
 0x177   :  { %1463 = vmatprep.subr.bf16.mxu1 %v2611_v59  ;;  %1869 = vmatprep.subr.bf16.mxu0 %v2698_v12  ;;  %v2756_v59 = vld [vmem:[#allocation8 + $0x8] sm:$0xff]  }
 0x178   :  { %v2763_v12 = vld [vmem:[#allocation8 + $0x68] sm:$0xff]  }
 0x179   :  { %1453 = vmatmul.mubr.bf16.vlgmr.msra.gmra.mrb[8].mxu1 %v3038_v17  ;;  %v2636_v17 = vld [vmem:[#allocation7 + $0x390] ss:$8 sps:$4 sm:$0xff]  }
 0x17a   :  { %1464 = vmatpush1.bf16.msra.mxu1 %v2609_v60  ;;  %1495 = vmatprep.mubr.bf16.mxu1 %v3032_v42  ;;  %v2627_v42 = vld [vmem:[#allocation7 + $0x360] ss:$8 sps:$4 sm:$0xff]  }
 0x17b   :  { %1465 = vmatprep.subr.bf16.mxu1 %v2614_v61  ;;  %1870 = vmatpush1.bf16.msra.mxu0 %v2696_v14  ;;  %v2716_v14 = vld [vmem:[#allocation7 + $0x534] ss:$8 sps:$4 sm:$0xff]  }
 0x17c   :  { %1871 = vmatprep.subr.bf16.mxu0 %v2701_v18  ;;  %v2722_v18 = vld [vmem:[#allocation7 + $0x554] ss:$8 sps:$4 sm:$0xff]  }
 0x17e   :  { %1466 = vmatpush1.bf16.msra.mxu1 %v2612_v62  ;;  %v2757_v62 = vld [vmem:[#allocation8 + $0x50] sm:$0xff]  }
 0x17f   :  { %1467 = vmatprep.subr.bf16.mxu1 %v2617_v63  ;;  %1872 = vmatpush1.bf16.msra.mxu0 %v2699_v20  ;;  %v2725_v20 = vld [vmem:[#allocation7 + $0x564] ss:$8 sps:$4 sm:$0xff]  }
 0x180   :  { %1873 = vmatprep.subr.bf16.mxu0 %v2704_v22  ;;  %v2728_v22 = vld [vmem:[#allocation7 + $0x574] ss:$8 sps:$4 sm:$0xff]  }
 0x182   :  { %1468 = vmatpush1.bf16.msra.mxu1 %v2615_v0 }
 0x183   :  { %1469 = vmatprep.subr.bf16.mxu1 %v2620_v1  ;;  %1874 = vmatpush1.bf16.msra.mxu0 %v2702_v24  ;;  %v2731_v24 = vld [vmem:[#allocation7 + $0x584] ss:$8 sps:$4 sm:$0xff]  }
 0x184   :  { %1886 = vmatprep.subr.bf16.mxu0 %v2707_v27  ;;  %v2732_v27 = vld [vmem:[#allocation7 + $0x590] ss:$8 sps:$4 sm:$0xff]  }
 0x186   :  { %1470 = vmatpush1.bf16.msra.mxu1 %v2618_v52 }
 0x187   :  { %1471 = vmatprep.subr.bf16.mxu1 %v2623_v2 }
 0x18a   :  { %1472 = vmatpush1.bf16.msra.mxu1 %v2621_v3  ;;  %v2758_v3 = vld [vmem:[#allocation8 + $0x10] sm:$0xff]  }
 0x18b   :  { %1473 = vmatprep.subr.bf16.mxu1 %v2626_v4 }
 0x18e   :  { %1474 = vmatpush1.bf16.msra.mxu1 %v2624_v5  ;;  %v2759_v5 = vld [vmem:[#allocation8 + $0x58] sm:$0xff]  }
 0x18f   :  { %1475 = vmatprep.subr.bf16.mxu1 %v2629_v6 }
 0x192   :  { %1476 = vmatpush1.bf16.msra.mxu1 %v2627_v42  ;;  %v2705_v42 = vld [vmem:[#allocation7 + $0x500] ss:$8 sps:$4 sm:$0xff]  }
 0x193   :  { %1477 = vmatprep.subr.bf16.mxu1 %v2632_v8  ;;  %v2760_v8 = vld [vmem:[#allocation8 + $0x18] sm:$0xff]  }
 0x196   :  { %1478 = vmatpush1.bf16.msra.mxu1 %v2630_v11  ;;  %v2762_v11 = vld [vmem:[#allocation8 + $0x20] sm:$0xff]  }
 0x197   :  { %1479 = vmatprep.subr.bf16.mxu1 %v2635_v13  ;;  %v2711_v13 = vld [vmem:[#allocation7 + $0x520] ss:$8 sps:$4 sm:$0xff]  }
 0x19a   :  { %1480 = vmatpush1.bf16.msra.mxu1 %v2633_v15  ;;  %v2714_v15 = vld [vmem:[#allocation7 + $0x530] ss:$8 sps:$4 sm:$0xff]  }
 0x19b   :  { %1481 = vmatprep.subr.bf16.mxu1 %v2638_v16  ;;  %v2719_v16 = vld [vmem:[#allocation7 + $0x544] ss:$8 sps:$4 sm:$0xff]  }
 0x19e   :  { %1482 = vmatpush1.bf16.msra.mxu1 %v2636_v17  ;;  %v2717_v17 = vld [vmem:[#allocation7 + $0x540] ss:$8 sps:$4 sm:$0xff]  }
 0x19f   :  { %1483 = vmatprep.subr.bf16.mxu1 %v2641_v19  ;;  %v2720_v19 = vld [vmem:[#allocation7 + $0x550] ss:$8 sps:$4 sm:$0xff]  }
 0x1a2   :  { %1484 = vmatpush1.bf16.msra.mxu1 %v2639_v21  ;;  %v2723_v21 = vld [vmem:[#allocation7 + $0x560] ss:$8 sps:$4 sm:$0xff]  }
 0x1a3   :  { %1485 = vmatprep.subr.bf16.mxu1 %v2644_v23  ;;  %v2726_v23 = vld [vmem:[#allocation7 + $0x570] ss:$8 sps:$4 sm:$0xff]  }
 0x1a6   :  { %1486 = vmatpush1.bf16.msra.mxu1 %v2642_v25  ;;  %v2729_v25 = vld [vmem:[#allocation7 + $0x580] ss:$8 sps:$4 sm:$0xff]  }
 0x1a7   :  { %1487 = vmatprep.subr.bf16.mxu1 %v2647_v26  ;;  %v2734_v26 = vld [vmem:[#allocation7 + $0x594] ss:$8 sps:$4 sm:$0xff]  }
 0x1aa   :  { %1488 = vmatpush1.bf16.msra.mxu1 %v2645_v28  ;;  %v2737_v28 = vld [vmem:[#allocation7 + $0x5a4] ss:$8 sps:$4 sm:$0xff]  }
 0x1ab   :  { %1489 = vmatprep.subr.bf16.mxu1 %v2650_v29  ;;  %v2735_v29 = vld [vmem:[#allocation7 + $0x5a0] ss:$8 sps:$4 sm:$0xff]  }
 0x1ae   :  { %1490 = vmatpush1.bf16.msra.mxu1 %v2648_v30  ;;  %v2740_v30 = vld [vmem:[#allocation7 + $0x5b4] ss:$8 sps:$4 sm:$0xff]  }
 0x1af   :  { %1491 = vmatprep.subr.bf16.mxu1 %v2653_v31  ;;  %v2738_v31 = vld [vmem:[#allocation7 + $0x5b0] ss:$8 sps:$4 sm:$0xff]  }
 0x1b2   :  { %1492 = vmatpush1.bf16.msra.mxu1 %v2651_v32  ;;  %v2743_v32 = vld [vmem:[#allocation7 + $0x5c4] ss:$8 sps:$4 sm:$0xff]  }
 0x1b3   :  { %1493 = vmatprep.subr.bf16.mxu1 %v2656_v33  ;;  %v2741_v33 = vld [vmem:[#allocation7 + $0x5c0] ss:$8 sps:$4 sm:$0xff]  }
 0x1b6   :  { %1494 = vmatpush1.bf16.msra.mxu1 %v2654_v34  ;;  %v2746_v34 = vld [vmem:[#allocation7 + $0x5d4] ss:$8 sps:$4 sm:$0xff]  }
 0x1b7   :  { %2406 = vmatprep.subr.bf16.mxu1 %v2753_v45 }
 0x1b9   :  { %1496 = vmatmul.mubr.bf16.vlgmr.msra.gmra.mrb[8].mxu1 %v3030_v38 }
 0x1ba   :  { %2407 = vmatpush3.bf16.msra.mxu1 %v2754_v46 }
 0x1bb   :  { %2408 = vmatprep.subr.bf16.mxu1 %v2755_v47 }
 0x1be   :  { %2409 = vmatpush3.bf16.msra.mxu1 %v2756_v59 }
 0x1bf   :  { %2410 = vmatprep.subr.bf16.mxu1 %v2757_v62  ;;  %v2764_v62 = vld [vmem:[#allocation8 + $0x28] sm:$0xff]  }
 0x1c2   :  { %2411 = vmatpush3.bf16.msra.mxu1 %v2758_v3 }
 0x1c3   :  { %2412 = vmatprep.subr.bf16.mxu1 %v2759_v5 }
 0x1c6   :  { %2413 = vmatpush3.bf16.msra.mxu1 %v2760_v8 }
 0x1c7   :  { %2414 = vmatprep.subr.bf16.mxu1 %v2761_v9 }
 0x1ca   :  { %2415 = vmatpush3.bf16.msra.mxu1 %v2762_v11 }
 0x1cb   :  { %2416 = vmatprep.subr.bf16.mxu1 %v2763_v12 }
 0x1ce   :  { %2417 = vmatpush3.bf16.msra.mxu1 %v2764_v62 }
 0x20c   :  { %v1031_v35 = vpop.f32.mrb[4].mxu1 }
 0x20d   :  { %v1033_v36 = vpop.f32.mrb[5].mxu1  ;;  %v1032_v44 = vadd.f32 %v1031_v35, %v670_v41  ;;  %v2744_v35 = vld [vmem:[#allocation7 + $0x5d0] ss:$8 sps:$4 sm:$0xff]  }
 0x20e   :  { %v1035_v37 = vpop.f32.mrb[6].mxu1  ;;  %v1034_v48 = vadd.f32 %v1033_v36, %v674_v43  ;;  %v2749_v36 = vld [vmem:[#allocation7 + $0x5e4] ss:$8 sps:$4 sm:$0xff]  }
 0x20f   :  { %v1037_v39 = vpop.f32.mrb[7].mxu1  ;;  %v1036_v50 = vadd.f32 %v1035_v37, %v670_v41  ;;  %v2747_v37 = vld [vmem:[#allocation7 + $0x5e0] ss:$8 sps:$4 sm:$0xff]   ;;  %v79_v41 = vld [vmem:[%s3080_s4 + $0xa] sm:$0x3] }
 0x210   :  { %v1038_v56 = vadd.f32 %v1037_v39, %v674_v43  ;;  %v2752_v39 = vld [vmem:[#allocation7 + $0x5f4] ss:$8 sps:$4 sm:$0xff]   ;;  %v1093_v43 = vrot.slane %v79_v41, %v3008_v53 }
 0x218   :  { %v1074_v49 = vpop.f32.mrb[12].mxu0 }
 0x219   :  { %v1075_v38 = vadd.f32 %v1074_v49, %v1032_v44  ;;  %v1076_v51 = vpop.f32.mrb[13].mxu0  ;;  %v1097_v44 = vrot.slane %v79_v41, %v3016_v55 }
 0x21a   :  { %v1077_v57 = vadd.f32 %v1076_v51, %v1034_v48  ;;  %v1078_v58 = vpop.f32.mrb[14].mxu0 }
 0x21b   :  { %v1079_v60 = vadd.f32 %v1078_v58, %v1036_v50  ;;  %v1080_v61 = vpop.f32.mrb[15].mxu0  ;;  %v1083_v0 = vmax.f32 %v1075_v38, 0.0 }
 0x21c   :  { %v1081_v63 = vadd.f32 %v1080_v61, %v1038_v56  ;;  %v1084_v52 = vmax.f32 %v1077_v57, 0.0 }
 0x21d   :  { %v1085_v1 = vmax.f32 %v1079_v60, 0.0 }
 0x21e   :  { %v1086_v2 = vmax.f32 %v1081_v63, 0.0  ;;  %v2765_v63 = vld [vmem:[#allocation8 + $0x70] sm:$0xff]  }
 0x21f   :  { %v1087_v4 = vpack.c.bf16 %v1085_v1, %v1083_v0  ;;  %v2766_v0 = vld [vmem:[#allocation8 + $0x30] sm:$0xff]   ;;  %2418 = vmatprep.subr.bf16.mxu1 %v2765_v63  ;;  %v2767_v1 = vld [vmem:[#allocation8 + $0x78] sm:$0xff]  }
 0x220   :  { %v1088_v6 = vpack.c.bf16 %v1086_v2, %v1084_v52  ;;  %2419 = vmatpush3.bf16.msra.mxu1 %v2766_v0  ;;  %v2768_v52 = vld [vmem:[#allocation8 + $0x38] sm:$0xff]   ;;  %v80_v2 = vld [vmem:[%s3080_s4 + $0xc] sm:$0x3] }
 0x221   :  { %2420 = vmatprep.subr.bf16.mxu1 %v2767_v1  ;;  %v1516_v3 = vrot.slane %v80_v2, %v3008_v53 }
 0x222   :  { %1875 = vmatprep.mubr.bf16.mxu0 %v1088_v6 }
 0x223   :  { %1876 = vmatmul.mubr.bf16.vlgmr.msra.gmra.mrb[16].mxu0 %v1087_v4  ;;  %v1520_v4 = vrot.slane %v80_v2, %v3016_v55  ;;  %v2380_v55 = vld [vmem:[%s3080_s4 + $0xe] ss:$0 sm:$0xff]  ;;  %s2906_s4 = smov [#allocation10]  }
 0x224   :  { %1887 = vmatpush1.bf16.msra.mxu0 %v2705_v42  ;;  %2421 = vmatpush3.bf16.msra.mxu1 %v2768_v52  ;;  %s2145_s29 = sshll.u32 %s2906_s4, 4  ;;  %s2146_s29 = int_to_ptr.vmem [resolvable:$true] %s2145_s29 }
 0x225   :  { %1888 = vmatprep.subr.bf16.mxu0 %v2710_v7  ;;  %s2865_s0 = scalar_lea.vmem %s2146_s29, 128  ;;  %p2870_p5 = scmp.lt.s32.totalorder %s2146_s29, %s2146_s29 }
 0x226   :  { %p2866_p4 = scmp.ne.s32.totalorder %s2146_s29, %s2865_s0  ;;  %p2871_p6 = scmp.lt.s32.totalorder %s2865_s0, %s2865_s0 }
 0x228   :  { %1889 = vmatpush1.bf16.msra.mxu0 %v2708_v10  ;;  %p2872_p7 = por %p2871_p6, %p2870_p5 }
 0x229   :  { %1890 = vmatprep.subr.bf16.mxu0 %v2713_v54 }
 0x22a   :  { %p2873_p8 = pnand %p2872_p7, %p2866_p4 }
 0x22c   :  { %1891 = vmatpush1.bf16.msra.mxu0 %v2711_v13 }
 0x22d   :  { %1892 = vmatprep.subr.bf16.mxu0 %v2716_v14 }
 0x230   :  { %1893 = vmatpush1.bf16.msra.mxu0 %v2714_v15 }
 0x231   :  { %1894 = vmatprep.subr.bf16.mxu0 %v2719_v16 }
 0x234   :  { %1895 = vmatpush1.bf16.msra.mxu0 %v2717_v17 }
 0x235   :  { %1896 = vmatprep.subr.bf16.mxu0 %v2722_v18 }
 0x238   :  { %1897 = vmatpush1.bf16.msra.mxu0 %v2720_v19 }
 0x239   :  { %1898 = vmatprep.subr.bf16.mxu0 %v2725_v20 }
 0x23c   :  { %1899 = vmatpush1.bf16.msra.mxu0 %v2723_v21 }
 0x23d   :  { %1900 = vmatprep.subr.bf16.mxu0 %v2728_v22 }
 0x240   :  { %1901 = vmatpush1.bf16.msra.mxu0 %v2726_v23 }
 0x241   :  { %1902 = vmatprep.subr.bf16.mxu0 %v2731_v24 }
 0x244   :  { %1903 = vmatpush1.bf16.msra.mxu0 %v2729_v25 }
 0x245   :  { %1904 = vmatprep.subr.bf16.mxu0 %v2734_v26 }
 0x248   :  { %1905 = vmatpush1.bf16.msra.mxu0 %v2732_v27 }
 0x249   :  { %1906 = vmatprep.subr.bf16.mxu0 %v2737_v28 }
 0x24c   :  { %1907 = vmatpush1.bf16.msra.mxu0 %v2735_v29 }
 0x24d   :  { %1908 = vmatprep.subr.bf16.mxu0 %v2740_v30 }
 0x250   :  { %1909 = vmatpush1.bf16.msra.mxu0 %v2738_v31 }
 0x251   :  { %1910 = vmatprep.subr.bf16.mxu0 %v2743_v32 }
 0x254   :  { %1911 = vmatpush1.bf16.msra.mxu0 %v2741_v33 }
 0x255   :  { %1912 = vmatprep.subr.bf16.mxu0 %v2746_v34 }
 0x258   :  { %1913 = vmatpush1.bf16.msra.mxu0 %v2744_v35 }
 0x259   :  { %1914 = vmatprep.subr.bf16.mxu0 %v2749_v36 }
 0x25c   :  { %1915 = vmatpush1.bf16.msra.mxu0 %v2747_v37 }
 0x25d   :  { %1916 = vmatprep.subr.bf16.mxu0 %v2752_v39 }
 0x260   :  { %1917 = vmatpush1.bf16.msra.mxu0 %v2750_v40 }
 0x28c   :  { %v1497_v45 = vpop.f32.mrb[8].mxu1 }
 0x28d   :  { %v2436_v46 = vadd.f32 %v1497_v45, %v1093_v43  ;;  %v1499_v47 = vpop.f32.mrb[9].mxu1 }
 0x28e   :  { %v2437_v48 = vadd.f32 %v1499_v47, %v1097_v44  ;;  %v1501_v49 = vpop.f32.mrb[10].mxu1 }
 0x28f   :  { %v2438_v50 = vadd.f32 %v1501_v49, %v1093_v43  ;;  %v1503_v38 = vpop.f32.mrb[11].mxu1  ;;  %v1506_v56 = vmax.f32 %v2436_v46, 0.0 }
 0x290   :  { %v2439_v51 = vadd.f32 %v1503_v38, %v1097_v44  ;;  %v1507_v58 = vmax.f32 %v2437_v48, 0.0 }
 0x291   :  { %v1508_v57 = vmax.f32 %v2438_v50, 0.0 }
 0x292   :  { %v1509_v59 = vmax.f32 %v2439_v51, 0.0 }
 0x293   :  { %v1510_v60 = vpack.c.bf16 %v1508_v57, %v1506_v56 }
 0x294   :  { %v1511_v61 = vpack.c.bf16 %v1509_v59, %v1507_v58 }
 0x296   :  { %1918 = vmatprep.mubr.bf16.mxu0 %v1511_v61 }
 0x297   :  { %1919 = vmatmul.mubr.bf16.vlgmr.msra.gmra.mrb[16].mxu0 %v1510_v60 }
 0x36a   :  { %v1920_v5 = vpop.f32.mrb[16].mxu0 }
 0x36b   :  { %v2440_v6 = vadd.f32 %v1920_v5, %v1516_v3  ;;  %v1922_v42 = vpop.f32.mrb[17].mxu0 }
 0x36c   :  { %v2441_v7 = vadd.f32 %v1922_v42, %v1520_v4  ;;  %v1924_v8 = vpop.f32.mrb[18].mxu0 }
 0x36d   :  { %v2442_v9 = vadd.f32 %v1924_v8, %v1516_v3  ;;  %v1926_v10 = vpop.f32.mrb[19].mxu0  ;;  %v1929_v11 = vmax.f32 %v2440_v6, 0.0 }
 0x36e   :  { %v2443_v54 = vadd.f32 %v1926_v10, %v1520_v4  ;;  %v1930_v13 = vmax.f32 %v2441_v7, 0.0 }
 0x36f   :  { %v1931_v12 = vmax.f32 %v2442_v9, 0.0 }
 0x370   :  { %v1932_v14 = vmax.f32 %v2443_v54, 0.0 }
 0x371   :  { %v1933_v15 = vpack.c.bf16 %v1931_v12, %v1929_v11 }
 0x372   :  { %v1934_v16 = vpack.c.bf16 %v1932_v14, %v1930_v13 }
 0x374   :  { %2101 = vmatprep.mubr.bf16.mxu1 %v1934_v16 }
 0x375   :  { %2102 = vmatmul.mubr.bf16.vlgmr.msra.gmra.mrb[12].mxu1 %v1933_v15 }
 0x448   :  { %v2422_v17 = vpop.f32.mrb[12].mxu1 }
 0x449   :  { %v2423_v53 = vpop.f32.mrb[13].mxu1 }
 0x44a   :  { %v2424_v18 = vadd.f32 %v2423_v53, %v2422_v17  ;;  %v2425_v19 = vpop.f32.mrb[14].mxu1 }
 0x44b   :  { %v2426_v20 = vpop.f32.mrb[15].mxu1 }
 0x44c   :  { %v2427_v21 = vadd.f32 %v2426_v20, %v2425_v19  ;;  %v2104_v22 = vadd.f32 %v2424_v18, %v2380_v55 }
 0x44e   :  { %2110 = vmax.xlane.f32.xlu0 %v2104_v22  ;;  %v2107_v23 = vadd.f32 %v2427_v21, %v2380_v55 }
 0x452   :  { %2112 = vmax.xlane.f32.xlu0 %v2107_v23 }
 0x4db   :  { %v2111_v24 = vpop.xlane.xlu0 %2110 }
 0x4dc   :  { %v2114_v25 = vsub.f32 %v2104_v22, %v2111_v24 }
 0x4de   :  { %v2116_v26 = vmul.f32 1.442695, %v2114_v25 }
 0x4df   :  { %v2113_v27 = vpop.xlane.xlu0 %2112 }
 0x4e0   :  { %2769 = vpow2.f32 %v2116_v26  ;;  %v2115_v28 = vsub.f32 %v2107_v23, %v2113_v27 }
 0x4e2   :  { %v2118_v29 = vmul.f32 1.442695, %v2115_v28 }
 0x4e4   :  { %2771 = vpow2.f32 %v2118_v29 }
 0x4ea   :  { %v2770_v30 = vpop.eup %2769 }
 0x4eb   :  { %2120 = vadd.xlane.f32.xlu1 %v2770_v30 }
 0x4ee   :  { %v2772_v31 = vpop.eup %2771 }
 0x4ef   :  { %2122 = vadd.xlane.f32.xlu1 %v2772_v31 }
 0x578   :  { %v2121_v32 = vpop.xlane.xlu1 %2120 }
 0x579   :  { %2773 = vrcp.f32 %v2121_v32 }
 0x57c   :  { %v2123_v33 = vpop.xlane.xlu1 %2122 }
 0x57d   :  { %2775 = vrcp.f32 %v2123_v33 }
 0x583   :  { %v2774_v34 = vpop.eup %2773 }
 0x584   :  { %v2126_v35 = vmul.f32 %v2774_v34, %v2770_v30 }
 0x586   :  { %v2128_v39 = vmul.f32 0.0, %v2126_v35 }
 0x587   :  { %v2776_v36 = vpop.eup %2775 }
 0x588   :  { %v2127_v37 = vmul.f32 %v2776_v36, %v2772_v31 }
 0x58a   :  { %v2129_v40 = vmul.f32 0.0, %v2127_v37 }
 0x58c   :  { %v2404_v41 = vpack.c.bf16 %v2129_v40, %v2128_v39 }
 0x58e   :  { %2405 = vst [vmem:[#allocation10] sm:$0xff] %v2404_v41  }
 0x58f   :  { %2876 = shalt.err (!%p2873_p8)
}
 0x590   :  { %s2877_s7 = scalar_lea.hbm %s3081_s5, 128 }
 0x591   :  { %p2878_p9 = scmp.ne.s32.totalorder %s3081_s5, %s2877_s7  ;;  %p2881_p10 = scmp.lt.u32.totalorder %s2877_s7, %s3081_s5 }
 0x593   :  { %p2883_p11 = pnand %p2881_p10, %p2878_p9 }
 0x595   :  { %2886 = shalt.err (!%p2883_p11)
}
 0x596   :  { %2151 = dma.vmem_to_hbm [thread:$0]  %s2146_s29, 128, %s3081_s5, [#allocation4], %s2899_s1, %s2899_s1, %s2900_s17  }
 0x597   :  { %2893 = dma.done.wait [#allocation4], 128  }
 0x598   :  { %2894 = vsyncadd [#allocation4], 4294967168 }
 0x599   :  { %2155 = vsyncpa [#allocation3], 1 }
 0x59a   :  { %2156 = vsyncpa [#allocation6], 1 }
 0x59b   :  { %2157 = vsyncpa [#allocation9], 1 }
 0x59c   :  { %2158 = vsyncpa [#allocation4], 1 }

</bundles_post_ra>
